<compile_context>
chip_gen: v7x
topology: tpu7x:2x2x1
jax: 0.10.0
libtpu: 0.0.40
codegen_flags: <defaults>
</compile_context>

<pallas_src>
import numpy as np
import jax
import jax.numpy as jnp
from jax.experimental import pallas as pl
from jax.experimental.pallas import tpu as pltpu

LANE = 128


def _ceil_div(a, b):
    return -(-a // b)


def _round_up(x, m):
    return _ceil_div(x, m) * m


def _pick_tile(n, *, max_tile, target_steps, multiple=1):
    """Batch tile: small enough for >=target_steps grid steps, >=multiple rows."""
    t = _ceil_div(n, target_steps)
    t = _round_up(t, multiple)
    return max(multiple, min(t, max_tile))


# ----------------------------------------------------------------------------
# Fused conv + bias + ReLU + 2x2 maxpool kernel
# ----------------------------------------------------------------------------
def _conv_relu_pool_kernel(x_ref, w_ref, b_ref, o_ref):
    """One batch tile of conv(5x5, valid) + bias + ReLU + maxpool(2,2).

    x_ref : (TB, 2, H/2, Lin) bf16  rows parity-split: x[b, p, r, :] = image row 2r+p,
                                    lane layout = w * Cin_p + c (padded lanes are 0)
    w_ref : (K, Lin, 256)     bf16  block-Toeplitz weights; output lanes [0,128) are
                                    pool-col offset dw=0, [128,256) are dw=1; within
                                    each half lane = pw * OC_p + oc
    b_ref : (1, 128)          f32   bias in (pw, oc) lane layout, padded lanes 0
    o_ref : (TB, PH, 128)     bf16  pooled activations, lane = pw * OC_p + oc
    """
    tb, ph = o_ref.shape[0], o_ref.shape[1]
    k = w_ref.shape[0]
    lin = x_ref.shape[3]
    n2 = w_ref.shape[2]

    acc = [jnp.zeros((tb * ph, n2), jnp.float32) for _ in range(2)]   # dh = 0, 1
    for s in range(k + 1):                      # s = dh + kh (input-row offset)
        xs = x_ref[:, s % 2, s // 2:s // 2 + ph, :].reshape(tb * ph, lin)
        for dh in (0, 1):
            kh = s - dh
            if 0 <= kh < k:
                acc[dh] = acc[dh] + jnp.dot(
                    xs, w_ref[kh], preferred_element_type=jnp.float32)

    def _max_dw(a):                    # pool over the 2 column offsets (lane halves)
        return jnp.maximum(a[:, :LANE], a[:, LANE:])

    y = jnp.maximum(_max_dw(acc[0]), _max_dw(acc[1]))    # pool over the 2 row offsets
    y = jnp.maximum(y + b_ref[...], 0.0)                 # bias + ReLU (hoisted out of pool)
    o_ref[...] = y.reshape(tb, ph, LANE).astype(o_ref.dtype)


def _conv_pool_weights(w_ochw, b_oc, *, cin_p, w_img, lin, oc_p, pw_out, k):
    """Build the block-Toeplitz weight (K, Lin, 256) and lane-layout bias (1, 128)."""
    oc_n, cin = int(w_ochw.shape[0]), int(w_ochw.shape[1])

    lane_in = np.arange(lin, dtype=np.int32)
    w_in = (lane_in // cin_p)[None, :, None, None]
    c_in = (lane_in % cin_p)[None, :, None, None]
    lane_out = np.arange(LANE, dtype=np.int32)
    pw = (lane_out // oc_p)[None, None, None, :]
    oc = (lane_out % oc_p)[None, None, None, :]
    dw = np.arange(2, dtype=np.int32)[None, None, :, None]
    kh = np.arange(k, dtype=np.int32)[:, None, None, None]

    kw = w_in - 2 * pw - dw
    valid = ((kw >= 0) & (kw < k) & (c_in < cin) & (w_in < w_img)
             & (oc < oc_n) & (pw < pw_out))
    tgt = (k, lin, 2, LANE)
    gathered = w_ochw[np.broadcast_to(np.minimum(oc, oc_n - 1), tgt),
                      np.broadcast_to(np.minimum(c_in, cin - 1), tgt),
                      np.broadcast_to(kh, tgt),
                      np.broadcast_to(np.clip(kw, 0, k - 1), tgt)]
    m = jnp.where(np.broadcast_to(valid, tgt), gathered, 0.0)
    m = m.reshape(k, lin, 2 * LANE).astype(jnp.bfloat16)

    oc_f = lane_out % oc_p
    pw_f = lane_out // oc_p
    b_valid = (oc_f < oc_n) & (pw_f < pw_out)
    b128 = jnp.where(b_valid, b_oc[np.minimum(oc_f, oc_n - 1)], 0.0)
    b128 = b128.reshape(1, LANE).astype(jnp.float32)
    return m, b128


def conv_relu_pool(x_bhl, w_ochw, b_oc, *, w_img, cin_p, oc_p, k=5,
                   max_tile=64, target_steps=8):
    """conv2d(5x5, valid, stride 1) + bias + ReLU + maxpool(2,2), fully fused.

    x_bhl: (B, H, Lin) bf16 with lane layout w * cin_p + c (padded lanes must be 0).
    Returns (B, PH, 128) bf16 with lane layout pw * oc_p + oc (padded lanes exactly 0).
    """
    B, H, lin = x_bhl.shape
    oh, ow = H - k + 1, w_img - k + 1
    ph, pw = oh // 2, ow // 2
    h2 = H // 2

    tb = _pick_tile(B, max_tile=max_tile, target_steps=target_steps)
    b_pad = _round_up(B, tb)

    # Parity-split rows so both pool-row offsets become contiguous in-kernel slices.
    x_par = x_bhl.reshape(B, h2, 2, lin).transpose(0, 2, 1, 3)        # (B, 2, H/2, Lin)
    if b_pad != B:
        x_par = jnp.pad(x_par, ((0, b_pad - B), (0, 0), (0, 0), (0, 0)))

    w_cat, b128 = _conv_pool_weights(w_ochw, b_oc, cin_p=cin_p, w_img=w_img,
                                     lin=lin, oc_p=oc_p, pw_out=pw, k=k)

    out = pl.pallas_call(
        _conv_relu_pool_kernel,
        out_shape=jax.ShapeDtypeStruct((b_pad, ph, LANE), jnp.bfloat16),
        grid=(b_pad // tb,),
        in_specs=[
            pl.BlockSpec((tb, 2, h2, lin), lambda i: (i, 0, 0, 0)),
            pl.BlockSpec((k, lin, 2 * LANE), lambda i: (0, 0, 0)),
            pl.BlockSpec((1, LANE), lambda i: (0, 0)),
        ],
        out_specs=pl.BlockSpec((tb, ph, LANE), lambda i: (i, 0, 0)),
        compiler_params=pltpu.CompilerParams(dimension_semantics=("parallel",)),
    )(x_par, w_cat, b128)
    return out[:B]


# ----------------------------------------------------------------------------
# Fused 3-layer MLP kernel (fc1 -> relu -> fc2 -> relu -> fc3)
# ----------------------------------------------------------------------------
def _mlp_kernel(x_ref, w1_ref, b1_ref, w2_ref, b2_ref, w3_ref, b3_ref, o_ref):
    h = jnp.dot(x_ref[...], w1_ref[...], preferred_element_type=jnp.float32)
    h = jnp.maximum(h + b1_ref[...], 0.0).astype(jnp.bfloat16)
    h = jnp.dot(h, w2_ref[...], preferred_element_type=jnp.float32)
    h = jnp.maximum(h + b2_ref[...], 0.0).astype(jnp.bfloat16)
    y = jnp.dot(h, w3_ref[...], preferred_element_type=jnp.float32) + b3_ref[...]
    o_ref[...] = y.astype(o_ref.dtype)


def classifier(x_flat, params, *, max_tile=512, target_steps=8):
    """x_flat: (B, 640) bf16 = conv2 output flattened in (ph, pw*16 + c) lane order."""
    B, dp = x_flat.shape                                   # dp = 5 * 128 = 640
    tb = _pick_tile(B, max_tile=max_tile, target_steps=target_steps, multiple=16)
    b_pad = _round_up(B, tb)
    x = x_flat if b_pad == B else jnp.pad(x_flat, ((0, b_pad - B), (0, 0)))

    # fc1: our row (ph*128 + pw*16 + c) -> torch column (c*25 + ph*5 + pw); padded rows 0.
    w1 = params["fc1_w"].reshape(120, 16, 5, 5).transpose(2, 3, 1, 0)   # (ph, pw, c, out)
    w1 = jnp.pad(w1, ((0, 0), (0, 3), (0, 0), (0, LANE - 120)))          # pw 5->8, out->128
    w1 = w1.reshape(dp, LANE).astype(jnp.bfloat16)
    b1 = jnp.pad(params["fc1_b"].reshape(1, 120),
                 ((0, 0), (0, LANE - 120))).astype(jnp.float32)
    w2 = jnp.pad(params["fc2_w"].T,
                 ((0, LANE - 120), (0, LANE - 84))).astype(jnp.bfloat16)
    b2 = jnp.pad(params["fc2_b"].reshape(1, 84),
                 ((0, 0), (0, LANE - 84))).astype(jnp.float32)
    w3 = jnp.pad(params["fc3_w"].T,
                 ((0, LANE - 84), (0, LANE - 10))).astype(jnp.bfloat16)
    b3 = jnp.pad(params["fc3_b"].reshape(1, 10),
                 ((0, 0), (0, LANE - 10))).astype(jnp.float32)

    out = pl.pallas_call(
        _mlp_kernel,
        out_shape=jax.ShapeDtypeStruct((b_pad, LANE), jnp.float32),
        grid=(b_pad // tb,),
        in_specs=[
            pl.BlockSpec((tb, dp), lambda i: (i, 0)),
            pl.BlockSpec((dp, LANE), lambda i: (0, 0)),
            pl.BlockSpec((1, LANE), lambda i: (0, 0)),
            pl.BlockSpec((LANE, LANE), lambda i: (0, 0)),
            pl.BlockSpec((1, LANE), lambda i: (0, 0)),
            pl.BlockSpec((LANE, LANE), lambda i: (0, 0)),
            pl.BlockSpec((1, LANE), lambda i: (0, 0)),
        ],
        out_specs=pl.BlockSpec((tb, LANE), lambda i: (i, 0)),
        compiler_params=pltpu.CompilerParams(dimension_semantics=("parallel",)),
    )(x, w1, b1, w2, b2, w3, b3)
    return out[:B, :10]


# ----------------------------------------------------------------------------
# Parameter init (deterministic, PyTorch-default-style uniform) and forward
# ----------------------------------------------------------------------------
def init_params(key):
    def uni(key, shape, fan_in):
        bound = 1.0 / jnp.sqrt(float(fan_in))
        return jax.random.uniform(key, shape, jnp.float32, -bound, bound)

    ks = jax.random.split(key, 10)
    return {
        "conv1_w": uni(ks[0], (6, 3, 5, 5), 3 * 5 * 5),
        "conv1_b": uni(ks[1], (6,), 3 * 5 * 5),
        "conv2_w": uni(ks[2], (16, 6, 5, 5), 6 * 5 * 5),
        "conv2_b": uni(ks[3], (16,), 6 * 5 * 5),
        "fc1_w":   uni(ks[4], (120, 400), 400),
        "fc1_b":   uni(ks[5], (120,), 400),
        "fc2_w":   uni(ks[6], (84, 120), 120),
        "fc2_b":   uni(ks[7], (84,), 120),
        "fc3_w":   uni(ks[8], (10, 84), 84),
        "fc3_b":   uni(ks[9], (10,), 84),
    }


@jax.jit
def net_forward(x_nchw, params):
    # x: (B, 3, 32, 32) float32 (NCHW, like the torch module)
    B = x_nchw.shape[0]
    x = jnp.transpose(x_nchw, (0, 2, 3, 1)).astype(jnp.bfloat16)   # NHWC, bf16 early
    x = x.reshape(B, 32, 32 * 3)                                   # lane = w*3 + c
    h = conv_relu_pool(x, params["conv1_w"], params["conv1_b"],
                       w_img=32, cin_p=3, oc_p=8)                  # (B, 14, 128)
    h = conv_relu_pool(h, params["conv2_w"], params["conv2_b"],
                       w_img=14, cin_p=8, oc_p=16)                 # (B, 5, 128)
    flat = h.reshape(B, 5 * LANE)                                  # (ph, pw, c) order
    return classifier(flat, params)                                # (B, 10)


if __name__ == "__main__":
    x = jax.random.normal(jax.random.PRNGKey(0), (2, 3, 32, 32), dtype=jnp.float32)
    params = init_params(jax.random.PRNGKey(42))

    logits = net_forward(x, params)
    jax.block_until_ready(logits)

    assert logits.shape == (2, 10) and logits.dtype == jnp.float32
    print("KERNEL_OK")
</pallas_src>

<mosaic_0001>
module attributes {stable_mosaic.version = 11 : i64} {
  func.func @_conv_relu_pool_kernel(%arg0: i32, %arg1: memref<1x2x16x96xbf16, #tpu.memory_space<vmem>>, %arg2: memref<5x96x256xbf16, #tpu.memory_space<vmem>>, %arg3: memref<1x128xf32, #tpu.memory_space<vmem>>, %arg4: memref<1x14x128xbf16, #tpu.memory_space<vmem>>) attributes {dimension_semantics = [#tpu.dimension_semantics<parallel>], iteration_bounds = array<i64: 2>, scalar_prefetch = 0 : i64, scratch_operands = 0 : i64, tpu.core_type = #tpu.core_type<tc>, window_params = [{transform_indices = @transform_0, window_bounds = array<i64: 1, 2, 16, 96>}, {pipeline_mode = #tpu.pipeline_mode<synchronous>, transform_indices = @transform_1, window_bounds = array<i64: 5, 96, 256>}, {pipeline_mode = #tpu.pipeline_mode<synchronous>, transform_indices = @transform_2, window_bounds = array<i64: 1, 128>}, {transform_indices = @transform_3, window_bounds = array<i64: 1, 14, 128>}]} {
    %cst = arith.constant 0.000000e+00 : f32
    %0 = vector.broadcast %cst : f32 to vector<14x256xf32>
    %cst_0 = arith.constant 0.000000e+00 : f32
    %1 = vector.broadcast %cst_0 : f32 to vector<14x256xf32>
    %c0 = arith.constant 0 : index
    %c0_1 = arith.constant 0 : index
    %c0_2 = arith.constant 0 : index
    %c0_3 = arith.constant 0 : index
    %2 = vector.load %arg1[%c0, %c0_1, %c0_2, %c0_3] : memref<1x2x16x96xbf16, #tpu.memory_space<vmem>>, vector<1x1x14x96xbf16>
    %3 = vector.shape_cast %2 : vector<1x1x14x96xbf16> to vector<1x14x96xbf16>
    %4 = vector.shape_cast %3 : vector<1x14x96xbf16> to vector<14x96xbf16>
    %c0_4 = arith.constant 0 : index
    %c0_5 = arith.constant 0 : index
    %c0_6 = arith.constant 0 : index
    %5 = vector.load %arg2[%c0_4, %c0_5, %c0_6] : memref<5x96x256xbf16, #tpu.memory_space<vmem>>, vector<1x96x256xbf16>
    %6 = vector.shape_cast %5 : vector<1x96x256xbf16> to vector<96x256xbf16>
    %cst_7 = arith.constant dense<0.000000e+00> : vector<14x256xf32>
    %7 = tpu.matmul %4, %6, %cst_7 {dimension_numbers = #tpu.dot_dimension_numbers<[1], [0], [0], [1], [0, 0, 1, 1], [], []>} : vector<14x96xbf16>, vector<96x256xbf16>, vector<14x256xf32> -> vector<14x256xf32>
    %8 = arith.addf %0, %7 : vector<14x256xf32>
    %c0_8 = arith.constant 0 : index
    %c1 = arith.constant 1 : index
    %c0_9 = arith.constant 0 : index
    %c0_10 = arith.constant 0 : index
    %9 = vector.load %arg1[%c0_8, %c1, %c0_9, %c0_10] : memref<1x2x16x96xbf16, #tpu.memory_space<vmem>>, vector<1x1x14x96xbf16>
    %10 = vector.shape_cast %9 : vector<1x1x14x96xbf16> to vector<1x14x96xbf16>
    %11 = vector.shape_cast %10 : vector<1x14x96xbf16> to vector<14x96xbf16>
    %c1_11 = arith.constant 1 : index
    %c0_12 = arith.constant 0 : index
    %c0_13 = arith.constant 0 : index
    %12 = vector.load %arg2[%c1_11, %c0_12, %c0_13] : memref<5x96x256xbf16, #tpu.memory_space<vmem>>, vector<1x96x256xbf16>
    %13 = vector.shape_cast %12 : vector<1x96x256xbf16> to vector<96x256xbf16>
    %cst_14 = arith.constant dense<0.000000e+00> : vector<14x256xf32>
    %14 = tpu.matmul %11, %13, %cst_14 {dimension_numbers = #tpu.dot_dimension_numbers<[1], [0], [0], [1], [0, 0, 1, 1], [], []>} : vector<14x96xbf16>, vector<96x256xbf16>, vector<14x256xf32> -> vector<14x256xf32>
    %15 = arith.addf %8, %14 : vector<14x256xf32>
    %c0_15 = arith.constant 0 : index
    %c0_16 = arith.constant 0 : index
    %c0_17 = arith.constant 0 : index
    %16 = vector.load %arg2[%c0_15, %c0_16, %c0_17] : memref<5x96x256xbf16, #tpu.memory_space<vmem>>, vector<1x96x256xbf16>
    %17 = vector.shape_cast %16 : vector<1x96x256xbf16> to vector<96x256xbf16>
    %cst_18 = arith.constant dense<0.000000e+00> : vector<14x256xf32>
    %18 = tpu.matmul %11, %17, %cst_18 {dimension_numbers = #tpu.dot_dimension_numbers<[1], [0], [0], [1], [0, 0, 1, 1], [], []>} : vector<14x96xbf16>, vector<96x256xbf16>, vector<14x256xf32> -> vector<14x256xf32>
    %19 = arith.addf %1, %18 : vector<14x256xf32>
    %c0_19 = arith.constant 0 : index
    %c0_20 = arith.constant 0 : index
    %c1_21 = arith.constant 1 : index
    %c0_22 = arith.constant 0 : index
    %20 = vector.load %arg1[%c0_19, %c0_20, %c1_21, %c0_22] : memref<1x2x16x96xbf16, #tpu.memory_space<vmem>>, vector<1x1x14x96xbf16>
    %21 = vector.shape_cast %20 : vector<1x1x14x96xbf16> to vector<1x14x96xbf16>
    %22 = vector.shape_cast %21 : vector<1x14x96xbf16> to vector<14x96xbf16>
    %c2 = arith.constant 2 : index
    %c0_23 = arith.constant 0 : index
    %c0_24 = arith.constant 0 : index
    %23 = vector.load %arg2[%c2, %c0_23, %c0_24] : memref<5x96x256xbf16, #tpu.memory_space<vmem>>, vector<1x96x256xbf16>
    %24 = vector.shape_cast %23 : vector<1x96x256xbf16> to vector<96x256xbf16>
    %cst_25 = arith.constant dense<0.000000e+00> : vector<14x256xf32>
    %25 = tpu.matmul %22, %24, %cst_25 {dimension_numbers = #tpu.dot_dimension_numbers<[1], [0], [0], [1], [0, 0, 1, 1], [], []>} : vector<14x96xbf16>, vector<96x256xbf16>, vector<14x256xf32> -> vector<14x256xf32>
    %26 = arith.addf %15, %25 : vector<14x256xf32>
    %c1_26 = arith.constant 1 : index
    %c0_27 = arith.constant 0 : index
    %c0_28 = arith.constant 0 : index
    %27 = vector.load %arg2[%c1_26, %c0_27, %c0_28] : memref<5x96x256xbf16, #tpu.memory_space<vmem>>, vector<1x96x256xbf16>
    %28 = vector.shape_cast %27 : vector<1x96x256xbf16> to vector<96x256xbf16>
    %cst_29 = arith.constant dense<0.000000e+00> : vector<14x256xf32>
    %29 = tpu.matmul %22, %28, %cst_29 {dimension_numbers = #tpu.dot_dimension_numbers<[1], [0], [0], [1], [0, 0, 1, 1], [], []>} : vector<14x96xbf16>, vector<96x256xbf16>, vector<14x256xf32> -> vector<14x256xf32>
    %30 = arith.addf %19, %29 : vector<14x256xf32>
    %c0_30 = arith.constant 0 : index
    %c1_31 = arith.constant 1 : index
    %c1_32 = arith.constant 1 : index
    %c0_33 = arith.constant 0 : index
    %31 = vector.load %arg1[%c0_30, %c1_31, %c1_32, %c0_33] : memref<1x2x16x96xbf16, #tpu.memory_space<vmem>>, vector<1x1x14x96xbf16>
    %32 = vector.shape_cast %31 : vector<1x1x14x96xbf16> to vector<1x14x96xbf16>
    %33 = vector.shape_cast %32 : vector<1x14x96xbf16> to vector<14x96xbf16>
    %c3 = arith.constant 3 : index
    %c0_34 = arith.constant 0 : index
    %c0_35 = arith.constant 0 : index
    %34 = vector.load %arg2[%c3, %c0_34, %c0_35] : memref<5x96x256xbf16, #tpu.memory_space<vmem>>, vector<1x96x256xbf16>
    %35 = vector.shape_cast %34 : vector<1x96x256xbf16> to vector<96x256xbf16>
    %cst_36 = arith.constant dense<0.000000e+00> : vector<14x256xf32>
    %36 = tpu.matmul %33, %35, %cst_36 {dimension_numbers = #tpu.dot_dimension_numbers<[1], [0], [0], [1], [0, 0, 1, 1], [], []>} : vector<14x96xbf16>, vector<96x256xbf16>, vector<14x256xf32> -> vector<14x256xf32>
    %37 = arith.addf %26, %36 : vector<14x256xf32>
    %c2_37 = arith.constant 2 : index
    %c0_38 = arith.constant 0 : index
    %c0_39 = arith.constant 0 : index
    %38 = vector.load %arg2[%c2_37, %c0_38, %c0_39] : memref<5x96x256xbf16, #tpu.memory_space<vmem>>, vector<1x96x256xbf16>
    %39 = vector.shape_cast %38 : vector<1x96x256xbf16> to vector<96x256xbf16>
    %cst_40 = arith.constant dense<0.000000e+00> : vector<14x256xf32>
    %40 = tpu.matmul %33, %39, %cst_40 {dimension_numbers = #tpu.dot_dimension_numbers<[1], [0], [0], [1], [0, 0, 1, 1], [], []>} : vector<14x96xbf16>, vector<96x256xbf16>, vector<14x256xf32> -> vector<14x256xf32>
    %41 = arith.addf %30, %40 : vector<14x256xf32>
    %c0_41 = arith.constant 0 : index
    %c0_42 = arith.constant 0 : index
    %c2_43 = arith.constant 2 : index
    %c0_44 = arith.constant 0 : index
    %42 = vector.load %arg1[%c0_41, %c0_42, %c2_43, %c0_44] : memref<1x2x16x96xbf16, #tpu.memory_space<vmem>>, vector<1x1x14x96xbf16>
    %43 = vector.shape_cast %42 : vector<1x1x14x96xbf16> to vector<1x14x96xbf16>
    %44 = vector.shape_cast %43 : vector<1x14x96xbf16> to vector<14x96xbf16>
    %c4 = arith.constant 4 : index
    %c0_45 = arith.constant 0 : index
    %c0_46 = arith.constant 0 : index
    %45 = vector.load %arg2[%c4, %c0_45, %c0_46] : memref<5x96x256xbf16, #tpu.memory_space<vmem>>, vector<1x96x256xbf16>
    %46 = vector.shape_cast %45 : vector<1x96x256xbf16> to vector<96x256xbf16>
    %cst_47 = arith.constant dense<0.000000e+00> : vector<14x256xf32>
    %47 = tpu.matmul %44, %46, %cst_47 {dimension_numbers = #tpu.dot_dimension_numbers<[1], [0], [0], [1], [0, 0, 1, 1], [], []>} : vector<14x96xbf16>, vector<96x256xbf16>, vector<14x256xf32> -> vector<14x256xf32>
    %48 = arith.addf %37, %47 : vector<14x256xf32>
    %c3_48 = arith.constant 3 : index
    %c0_49 = arith.constant 0 : index
    %c0_50 = arith.constant 0 : index
    %49 = vector.load %arg2[%c3_48, %c0_49, %c0_50] : memref<5x96x256xbf16, #tpu.memory_space<vmem>>, vector<1x96x256xbf16>
    %50 = vector.shape_cast %49 : vector<1x96x256xbf16> to vector<96x256xbf16>
    %cst_51 = arith.constant dense<0.000000e+00> : vector<14x256xf32>
    %51 = tpu.matmul %44, %50, %cst_51 {dimension_numbers = #tpu.dot_dimension_numbers<[1], [0], [0], [1], [0, 0, 1, 1], [], []>} : vector<14x96xbf16>, vector<96x256xbf16>, vector<14x256xf32> -> vector<14x256xf32>
    %52 = arith.addf %41, %51 : vector<14x256xf32>
    %c0_52 = arith.constant 0 : index
    %c1_53 = arith.constant 1 : index
    %c2_54 = arith.constant 2 : index
    %c0_55 = arith.constant 0 : index
    %53 = vector.load %arg1[%c0_52, %c1_53, %c2_54, %c0_55] : memref<1x2x16x96xbf16, #tpu.memory_space<vmem>>, vector<1x1x14x96xbf16>
    %54 = vector.shape_cast %53 : vector<1x1x14x96xbf16> to vector<1x14x96xbf16>
    %55 = vector.shape_cast %54 : vector<1x14x96xbf16> to vector<14x96xbf16>
    %c4_56 = arith.constant 4 : index
    %c0_57 = arith.constant 0 : index
    %c0_58 = arith.constant 0 : index
    %56 = vector.load %arg2[%c4_56, %c0_57, %c0_58] : memref<5x96x256xbf16, #tpu.memory_space<vmem>>, vector<1x96x256xbf16>
    %57 = vector.shape_cast %56 : vector<1x96x256xbf16> to vector<96x256xbf16>
    %cst_59 = arith.constant dense<0.000000e+00> : vector<14x256xf32>
    %58 = tpu.matmul %55, %57, %cst_59 {dimension_numbers = #tpu.dot_dimension_numbers<[1], [0], [0], [1], [0, 0, 1, 1], [], []>} : vector<14x96xbf16>, vector<96x256xbf16>, vector<14x256xf32> -> vector<14x256xf32>
    %59 = arith.addf %52, %58 : vector<14x256xf32>
    %60 = vector.extract_strided_slice %48 {offsets = [0, 0], sizes = [14, 128], strides = [1, 1]} : vector<14x256xf32> to vector<14x128xf32>
    %61 = vector.extract_strided_slice %48 {offsets = [0, 128], sizes = [14, 128], strides = [1, 1]} : vector<14x256xf32> to vector<14x128xf32>
    %62 = arith.maximumf %60, %61 : vector<14x128xf32>
    %63 = vector.extract_strided_slice %59 {offsets = [0, 0], sizes = [14, 128], strides = [1, 1]} : vector<14x256xf32> to vector<14x128xf32>
    %64 = vector.extract_strided_slice %59 {offsets = [0, 128], sizes = [14, 128], strides = [1, 1]} : vector<14x256xf32> to vector<14x128xf32>
    %65 = arith.maximumf %63, %64 : vector<14x128xf32>
    %66 = arith.maximumf %62, %65 : vector<14x128xf32>
    %c0_60 = arith.constant 0 : index
    %c0_61 = arith.constant 0 : index
    %67 = vector.load %arg3[%c0_60, %c0_61] : memref<1x128xf32, #tpu.memory_space<vmem>>, vector<1x128xf32>
    %68 = vector.broadcast %67 : vector<1x128xf32> to vector<14x128xf32>
    %69 = arith.addf %66, %68 : vector<14x128xf32>
    %cst_62 = arith.constant 0.000000e+00 : f32
    %70 = vector.broadcast %cst_62 : f32 to vector<14x128xf32>
    %71 = arith.maximumf %69, %70 : vector<14x128xf32>
    %72 = vector.shape_cast %71 : vector<14x128xf32> to vector<1x14x128xf32>
    %73 = arith.truncf %72 : vector<1x14x128xf32> to vector<1x14x128xbf16>
    %c0_63 = arith.constant 0 : index
    %c0_64 = arith.constant 0 : index
    %c0_65 = arith.constant 0 : index
    %74 = vector.load %arg4[%c0_63, %c0_64, %c0_65] : memref<1x14x128xbf16, #tpu.memory_space<vmem>>, vector<1x14x128xbf16>
    tpu.vector_store %arg4[%c0_63, %c0_64, %c0_65], %73 {strides = array<i32>} : memref<1x14x128xbf16, #tpu.memory_space<vmem>>, vector<1x14x128xbf16>,
    return
  }
  func.func @transform_0(%arg0: i32) -> (i32, i32, i32, i32) {
    %c0_i32 = arith.constant 0 : i32
    %c0_i32_0 = arith.constant 0 : i32
    %c0_i32_1 = arith.constant 0 : i32
    %c0_i32_2 = arith.constant 0 : i32
    return %arg0, %c0_i32, %c0_i32_0, %c0_i32_1 : i32, i32, i32, i32
  }
  func.func @transform_1(%arg0: i32) -> (i32, i32, i32) {
    %c0_i32 = arith.constant 0 : i32
    %c0_i32_0 = arith.constant 0 : i32
    %c0_i32_1 = arith.constant 0 : i32
    %c0_i32_2 = arith.constant 0 : i32
    return %c0_i32, %c0_i32_0, %c0_i32_1 : i32, i32, i32
  }
  func.func @transform_2(%arg0: i32) -> (i32, i32) {
    %c0_i32 = arith.constant 0 : i32
    %c0_i32_0 = arith.constant 0 : i32
    %c0_i32_1 = arith.constant 0 : i32
    return %c0_i32, %c0_i32_0 : i32, i32
  }
  func.func @transform_3(%arg0: i32) -> (i32, i32, i32) {
    %c0_i32 = arith.constant 0 : i32
    %c0_i32_0 = arith.constant 0 : i32
    %c0_i32_1 = arith.constant 0 : i32
    return %arg0, %c0_i32, %c0_i32_0 : i32, i32, i32
  }
}

module attributes {stable_mosaic.version = 11 : i64} {
  func.func @_conv_relu_pool_kernel(%arg0: i32, %arg1: memref<1x2x7x128xbf16, #tpu.memory_space<vmem>>, %arg2: memref<5x128x256xbf16, #tpu.memory_space<vmem>>, %arg3: memref<1x128xf32, #tpu.memory_space<vmem>>, %arg4: memref<1x5x128xbf16, #tpu.memory_space<vmem>>) attributes {dimension_semantics = [#tpu.dimension_semantics<parallel>], iteration_bounds = array<i64: 2>, scalar_prefetch = 0 : i64, scratch_operands = 0 : i64, tpu.core_type = #tpu.core_type<tc>, window_params = [{transform_indices = @transform_0, window_bounds = array<i64: 1, 2, 7, 128>}, {pipeline_mode = #tpu.pipeline_mode<synchronous>, transform_indices = @transform_1, window_bounds = array<i64: 5, 128, 256>}, {pipeline_mode = #tpu.pipeline_mode<synchronous>, transform_indices = @transform_2, window_bounds = array<i64: 1, 128>}, {transform_indices = @transform_3, window_bounds = array<i64: 1, 5, 128>}]} {
    %cst = arith.constant 0.000000e+00 : f32
    %0 = vector.broadcast %cst : f32 to vector<5x256xf32>
    %cst_0 = arith.constant 0.000000e+00 : f32
    %1 = vector.broadcast %cst_0 : f32 to vector<5x256xf32>
    %c0 = arith.constant 0 : index
    %c0_1 = arith.constant 0 : index
    %c0_2 = arith.constant 0 : index
    %c0_3 = arith.constant 0 : index
    %2 = vector.load %arg1[%c0, %c0_1, %c0_2, %c0_3] : memref<1x2x7x128xbf16, #tpu.memory_space<vmem>>, vector<1x1x5x128xbf16>
    %3 = vector.shape_cast %2 : vector<1x1x5x128xbf16> to vector<1x5x128xbf16>
    %4 = vector.shape_cast %3 : vector<1x5x128xbf16> to vector<5x128xbf16>
    %c0_4 = arith.constant 0 : index
    %c0_5 = arith.constant 0 : index
    %c0_6 = arith.constant 0 : index
    %5 = vector.load %arg2[%c0_4, %c0_5, %c0_6] : memref<5x128x256xbf16, #tpu.memory_space<vmem>>, vector<1x128x256xbf16>
    %6 = vector.shape_cast %5 : vector<1x128x256xbf16> to vector<128x256xbf16>
    %cst_7 = arith.constant dense<0.000000e+00> : vector<5x256xf32>
    %7 = tpu.matmul %4, %6, %cst_7 {dimension_numbers = #tpu.dot_dimension_numbers<[1], [0], [0], [1], [0, 0, 1, 1], [], []>} : vector<5x128xbf16>, vector<128x256xbf16>, vector<5x256xf32> -> vector<5x256xf32>
    %8 = arith.addf %0, %7 : vector<5x256xf32>
    %c0_8 = arith.constant 0 : index
    %c1 = arith.constant 1 : index
    %c0_9 = arith.constant 0 : index
    %c0_10 = arith.constant 0 : index
    %9 = vector.load %arg1[%c0_8, %c1, %c0_9, %c0_10] : memref<1x2x7x128xbf16, #tpu.memory_space<vmem>>, vector<1x1x5x128xbf16>
    %10 = vector.shape_cast %9 : vector<1x1x5x128xbf16> to vector<1x5x128xbf16>
    %11 = vector.shape_cast %10 : vector<1x5x128xbf16> to vector<5x128xbf16>
    %c1_11 = arith.constant 1 : index
    %c0_12 = arith.constant 0 : index
    %c0_13 = arith.constant 0 : index
    %12 = vector.load %arg2[%c1_11, %c0_12, %c0_13] : memref<5x128x256xbf16, #tpu.memory_space<vmem>>, vector<1x128x256xbf16>
    %13 = vector.shape_cast %12 : vector<1x128x256xbf16> to vector<128x256xbf16>
    %cst_14 = arith.constant dense<0.000000e+00> : vector<5x256xf32>
    %14 = tpu.matmul %11, %13, %cst_14 {dimension_numbers = #tpu.dot_dimension_numbers<[1], [0], [0], [1], [0, 0, 1, 1], [], []>} : vector<5x128xbf16>, vector<128x256xbf16>, vector<5x256xf32> -> vector<5x256xf32>
    %15 = arith.addf %8, %14 : vector<5x256xf32>
    %c0_15 = arith.constant 0 : index
    %c0_16 = arith.constant 0 : index
    %c0_17 = arith.constant 0 : index
    %16 = vector.load %arg2[%c0_15, %c0_16, %c0_17] : memref<5x128x256xbf16, #tpu.memory_space<vmem>>, vector<1x128x256xbf16>
    %17 = vector.shape_cast %16 : vector<1x128x256xbf16> to vector<128x256xbf16>
    %cst_18 = arith.constant dense<0.000000e+00> : vector<5x256xf32>
    %18 = tpu.matmul %11, %17, %cst_18 {dimension_numbers = #tpu.dot_dimension_numbers<[1], [0], [0], [1], [0, 0, 1, 1], [], []>} : vector<5x128xbf16>, vector<128x256xbf16>, vector<5x256xf32> -> vector<5x256xf32>
    %19 = arith.addf %1, %18 : vector<5x256xf32>
    %c0_19 = arith.constant 0 : index
    %c0_20 = arith.constant 0 : index
    %c1_21 = arith.constant 1 : index
    %c0_22 = arith.constant 0 : index
    %20 = vector.load %arg1[%c0_19, %c0_20, %c1_21, %c0_22] : memref<1x2x7x128xbf16, #tpu.memory_space<vmem>>, vector<1x1x5x128xbf16>
    %21 = vector.shape_cast %20 : vector<1x1x5x128xbf16> to vector<1x5x128xbf16>
    %22 = vector.shape_cast %21 : vector<1x5x128xbf16> to vector<5x128xbf16>
    %c2 = arith.constant 2 : index
    %c0_23 = arith.constant 0 : index
    %c0_24 = arith.constant 0 : index
    %23 = vector.load %arg2[%c2, %c0_23, %c0_24] : memref<5x128x256xbf16, #tpu.memory_space<vmem>>, vector<1x128x256xbf16>
    %24 = vector.shape_cast %23 : vector<1x128x256xbf16> to vector<128x256xbf16>
    %cst_25 = arith.constant dense<0.000000e+00> : vector<5x256xf32>
    %25 = tpu.matmul %22, %24, %cst_25 {dimension_numbers = #tpu.dot_dimension_numbers<[1], [0], [0], [1], [0, 0, 1, 1], [], []>} : vector<5x128xbf16>, vector<128x256xbf16>, vector<5x256xf32> -> vector<5x256xf32>
    %26 = arith.addf %15, %25 : vector<5x256xf32>
    %c1_26 = arith.constant 1 : index
    %c0_27 = arith.constant 0 : index
    %c0_28 = arith.constant 0 : index
    %27 = vector.load %arg2[%c1_26, %c0_27, %c0_28] : memref<5x128x256xbf16, #tpu.memory_space<vmem>>, vector<1x128x256xbf16>
    %28 = vector.shape_cast %27 : vector<1x128x256xbf16> to vector<128x256xbf16>
    %cst_29 = arith.constant dense<0.000000e+00> : vector<5x256xf32>
    %29 = tpu.matmul %22, %28, %cst_29 {dimension_numbers = #tpu.dot_dimension_numbers<[1], [0], [0], [1], [0, 0, 1, 1], [], []>} : vector<5x128xbf16>, vector<128x256xbf16>, vector<5x256xf32> -> vector<5x256xf32>
    %30 = arith.addf %19, %29 : vector<5x256xf32>
    %c0_30 = arith.constant 0 : index
    %c1_31 = arith.constant 1 : index
    %c1_32 = arith.constant 1 : index
    %c0_33 = arith.constant 0 : index
    %31 = vector.load %arg1[%c0_30, %c1_31, %c1_32, %c0_33] : memref<1x2x7x128xbf16, #tpu.memory_space<vmem>>, vector<1x1x5x128xbf16>
    %32 = vector.shape_cast %31 : vector<1x1x5x128xbf16> to vector<1x5x128xbf16>
    %33 = vector.shape_cast %32 : vector<1x5x128xbf16> to vector<5x128xbf16>
    %c3 = arith.constant 3 : index
    %c0_34 = arith.constant 0 : index
    %c0_35 = arith.constant 0 : index
    %34 = vector.load %arg2[%c3, %c0_34, %c0_35] : memref<5x128x256xbf16, #tpu.memory_space<vmem>>, vector<1x128x256xbf16>
    %35 = vector.shape_cast %34 : vector<1x128x256xbf16> to vector<128x256xbf16>
    %cst_36 = arith.constant dense<0.000000e+00> : vector<5x256xf32>
    %36 = tpu.matmul %33, %35, %cst_36 {dimension_numbers = #tpu.dot_dimension_numbers<[1], [0], [0], [1], [0, 0, 1, 1], [], []>} : vector<5x128xbf16>, vector<128x256xbf16>, vector<5x256xf32> -> vector<5x256xf32>
    %37 = arith.addf %26, %36 : vector<5x256xf32>
    %c2_37 = arith.constant 2 : index
    %c0_38 = arith.constant 0 : index
    %c0_39 = arith.constant 0 : index
    %38 = vector.load %arg2[%c2_37, %c0_38, %c0_39] : memref<5x128x256xbf16, #tpu.memory_space<vmem>>, vector<1x128x256xbf16>
    %39 = vector.shape_cast %38 : vector<1x128x256xbf16> to vector<128x256xbf16>
    %cst_40 = arith.constant dense<0.000000e+00> : vector<5x256xf32>
    %40 = tpu.matmul %33, %39, %cst_40 {dimension_numbers = #tpu.dot_dimension_numbers<[1], [0], [0], [1], [0, 0, 1, 1], [], []>} : vector<5x128xbf16>, vector<128x256xbf16>, vector<5x256xf32> -> vector<5x256xf32>
    %41 = arith.addf %30, %40 : vector<5x256xf32>
    %c0_41 = arith.constant 0 : index
    %c0_42 = arith.constant 0 : index
    %c2_43 = arith.constant 2 : index
    %c0_44 = arith.constant 0 : index
    %42 = vector.load %arg1[%c0_41, %c0_42, %c2_43, %c0_44] : memref<1x2x7x128xbf16, #tpu.memory_space<vmem>>, vector<1x1x5x128xbf16>
    %43 = vector.shape_cast %42 : vector<1x1x5x128xbf16> to vector<1x5x128xbf16>
    %44 = vector.shape_cast %43 : vector<1x5x128xbf16> to vector<5x128xbf16>
    %c4 = arith.constant 4 : index
    %c0_45 = arith.constant 0 : index
    %c0_46 = arith.constant 0 : index
    %45 = vector.load %arg2[%c4, %c0_45, %c0_46] : memref<5x128x256xbf16, #tpu.memory_space<vmem>>, vector<1x128x256xbf16>
    %46 = vector.shape_cast %45 : vector<1x128x256xbf16> to vector<128x256xbf16>
    %cst_47 = arith.constant dense<0.000000e+00> : vector<5x256xf32>
    %47 = tpu.matmul %44, %46, %cst_47 {dimension_numbers = #tpu.dot_dimension_numbers<[1], [0], [0], [1], [0, 0, 1, 1], [], []>} : vector<5x128xbf16>, vector<128x256xbf16>, vector<5x256xf32> -> vector<5x256xf32>
    %48 = arith.addf %37, %47 : vector<5x256xf32>
    %c3_48 = arith.constant 3 : index
    %c0_49 = arith.constant 0 : index
    %c0_50 = arith.constant 0 : index
    %49 = vector.load %arg2[%c3_48, %c0_49, %c0_50] : memref<5x128x256xbf16, #tpu.memory_space<vmem>>, vector<1x128x256xbf16>
    %50 = vector.shape_cast %49 : vector<1x128x256xbf16> to vector<128x256xbf16>
    %cst_51 = arith.constant dense<0.000000e+00> : vector<5x256xf32>
    %51 = tpu.matmul %44, %50, %cst_51 {dimension_numbers = #tpu.dot_dimension_numbers<[1], [0], [0], [1], [0, 0, 1, 1], [], []>} : vector<5x128xbf16>, vector<128x256xbf16>, vector<5x256xf32> -> vector<5x256xf32>
    %52 = arith.addf %41, %51 : vector<5x256xf32>
    %c0_52 = arith.constant 0 : index
    %c1_53 = arith.constant 1 : index
    %c2_54 = arith.constant 2 : index
    %c0_55 = arith.constant 0 : index
    %53 = vector.load %arg1[%c0_52, %c1_53, %c2_54, %c0_55] : memref<1x2x7x128xbf16, #tpu.memory_space<vmem>>, vector<1x1x5x128xbf16>
    %54 = vector.shape_cast %53 : vector<1x1x5x128xbf16> to vector<1x5x128xbf16>
    %55 = vector.shape_cast %54 : vector<1x5x128xbf16> to vector<5x128xbf16>
    %c4_56 = arith.constant 4 : index
    %c0_57 = arith.constant 0 : index
    %c0_58 = arith.constant 0 : index
    %56 = vector.load %arg2[%c4_56, %c0_57, %c0_58] : memref<5x128x256xbf16, #tpu.memory_space<vmem>>, vector<1x128x256xbf16>
    %57 = vector.shape_cast %56 : vector<1x128x256xbf16> to vector<128x256xbf16>
    %cst_59 = arith.constant dense<0.000000e+00> : vector<5x256xf32>
    %58 = tpu.matmul %55, %57, %cst_59 {dimension_numbers = #tpu.dot_dimension_numbers<[1], [0], [0], [1], [0, 0, 1, 1], [], []>} : vector<5x128xbf16>, vector<128x256xbf16>, vector<5x256xf32> -> vector<5x256xf32>
    %59 = arith.addf %52, %58 : vector<5x256xf32>
    %60 = vector.extract_strided_slice %48 {offsets = [0, 0], sizes = [5, 128], strides = [1, 1]} : vector<5x256xf32> to vector<5x128xf32>
    %61 = vector.extract_strided_slice %48 {offsets = [0, 128], sizes = [5, 128], strides = [1, 1]} : vector<5x256xf32> to vector<5x128xf32>
    %62 = arith.maximumf %60, %61 : vector<5x128xf32>
    %63 = vector.extract_strided_slice %59 {offsets = [0, 0], sizes = [5, 128], strides = [1, 1]} : vector<5x256xf32> to vector<5x128xf32>
    %64 = vector.extract_strided_slice %59 {offsets = [0, 128], sizes = [5, 128], strides = [1, 1]} : vector<5x256xf32> to vector<5x128xf32>
    %65 = arith.maximumf %63, %64 : vector<5x128xf32>
    %66 = arith.maximumf %62, %65 : vector<5x128xf32>
    %c0_60 = arith.constant 0 : index
    %c0_61 = arith.constant 0 : index
    %67 = vector.load %arg3[%c0_60, %c0_61] : memref<1x128xf32, #tpu.memory_space<vmem>>, vector<1x128xf32>
    %68 = vector.broadcast %67 : vector<1x128xf32> to vector<5x128xf32>
    %69 = arith.addf %66, %68 : vector<5x128xf32>
    %cst_62 = arith.constant 0.000000e+00 : f32
    %70 = vector.broadcast %cst_62 : f32 to vector<5x128xf32>
    %71 = arith.maximumf %69, %70 : vector<5x128xf32>
    %72 = vector.shape_cast %71 : vector<5x128xf32> to vector<1x5x128xf32>
    %73 = arith.truncf %72 : vector<1x5x128xf32> to vector<1x5x128xbf16>
    %c0_63 = arith.constant 0 : index
    %c0_64 = arith.constant 0 : index
    %c0_65 = arith.constant 0 : index
    %74 = vector.load %arg4[%c0_63, %c0_64, %c0_65] : memref<1x5x128xbf16, #tpu.memory_space<vmem>>, vector<1x5x128xbf16>
    tpu.vector_store %arg4[%c0_63, %c0_64, %c0_65], %73 {strides = array<i32>} : memref<1x5x128xbf16, #tpu.memory_space<vmem>>, vector<1x5x128xbf16>,
    return
  }
  func.func @transform_0(%arg0: i32) -> (i32, i32, i32, i32) {
    %c0_i32 = arith.constant 0 : i32
    %c0_i32_0 = arith.constant 0 : i32
    %c0_i32_1 = arith.constant 0 : i32
    %c0_i32_2 = arith.constant 0 : i32
    return %arg0, %c0_i32, %c0_i32_0, %c0_i32_1 : i32, i32, i32, i32
  }
  func.func @transform_1(%arg0: i32) -> (i32, i32, i32) {
    %c0_i32 = arith.constant 0 : i32
    %c0_i32_0 = arith.constant 0 : i32
    %c0_i32_1 = arith.constant 0 : i32
    %c0_i32_2 = arith.constant 0 : i32
    return %c0_i32, %c0_i32_0, %c0_i32_1 : i32, i32, i32
  }
  func.func @transform_2(%arg0: i32) -> (i32, i32) {
    %c0_i32 = arith.constant 0 : i32
    %c0_i32_0 = arith.constant 0 : i32
    %c0_i32_1 = arith.constant 0 : i32
    return %c0_i32, %c0_i32_0 : i32, i32
  }
  func.func @transform_3(%arg0: i32) -> (i32, i32, i32) {
    %c0_i32 = arith.constant 0 : i32
    %c0_i32_0 = arith.constant 0 : i32
    %c0_i32_1 = arith.constant 0 : i32
    return %arg0, %c0_i32, %c0_i32_0 : i32, i32, i32
  }
}

module attributes {stable_mosaic.version = 11 : i64} {
  func.func @_mlp_kernel(%arg0: i32, %arg1: memref<16x640xbf16, #tpu.memory_space<vmem>>, %arg2: memref<640x128xbf16, #tpu.memory_space<vmem>>, %arg3: memref<1x128xf32, #tpu.memory_space<vmem>>, %arg4: memref<128x128xbf16, #tpu.memory_space<vmem>>, %arg5: memref<1x128xf32, #tpu.memory_space<vmem>>, %arg6: memref<128x128xbf16, #tpu.memory_space<vmem>>, %arg7: memref<1x128xf32, #tpu.memory_space<vmem>>, %arg8: memref<16x128xf32, #tpu.memory_space<vmem>>) attributes {dimension_semantics = [#tpu.dimension_semantics<parallel>], iteration_bounds = array<i64: 1>, scalar_prefetch = 0 : i64, scratch_operands = 0 : i64, tpu.core_type = #tpu.core_type<tc>, window_params = [{transform_indices = @transform_0, window_bounds = array<i64: 16, 640>}, {pipeline_mode = #tpu.pipeline_mode<synchronous>, transform_indices = @transform_1, window_bounds = array<i64: 640, 128>}, {pipeline_mode = #tpu.pipeline_mode<synchronous>, transform_indices = @transform_2, window_bounds = array<i64: 1, 128>}, {pipeline_mode = #tpu.pipeline_mode<synchronous>, transform_indices = @transform_3, window_bounds = array<i64: 128, 128>}, {pipeline_mode = #tpu.pipeline_mode<synchronous>, transform_indices = @transform_4, window_bounds = array<i64: 1, 128>}, {pipeline_mode = #tpu.pipeline_mode<synchronous>, transform_indices = @transform_5, window_bounds = array<i64: 128, 128>}, {pipeline_mode = #tpu.pipeline_mode<synchronous>, transform_indices = @transform_6, window_bounds = array<i64: 1, 128>}, {transform_indices = @transform_7, window_bounds = array<i64: 16, 128>}]} {
    %c0 = arith.constant 0 : index
    %c0_0 = arith.constant 0 : index
    %0 = vector.load %arg1[%c0, %c0_0] : memref<16x640xbf16, #tpu.memory_space<vmem>>, vector<16x640xbf16>
    %c0_1 = arith.constant 0 : index
    %c0_2 = arith.constant 0 : index
    %1 = vector.load %arg2[%c0_1, %c0_2] : memref<640x128xbf16, #tpu.memory_space<vmem>>, vector<640x128xbf16>
    %cst = arith.constant dense<0.000000e+00> : vector<16x128xf32>
    %2 = tpu.matmul %0, %1, %cst {dimension_numbers = #tpu.dot_dimension_numbers<[1], [0], [0], [1], [0, 0, 1, 1], [], []>} : vector<16x640xbf16>, vector<640x128xbf16>, vector<16x128xf32> -> vector<16x128xf32>
    %c0_3 = arith.constant 0 : index
    %c0_4 = arith.constant 0 : index
    %3 = vector.load %arg3[%c0_3, %c0_4] : memref<1x128xf32, #tpu.memory_space<vmem>>, vector<1x128xf32>
    %4 = vector.broadcast %3 : vector<1x128xf32> to vector<16x128xf32>
    %5 = arith.addf %2, %4 : vector<16x128xf32>
    %cst_5 = arith.constant 0.000000e+00 : f32
    %6 = vector.broadcast %cst_5 : f32 to vector<16x128xf32>
    %7 = arith.maximumf %5, %6 : vector<16x128xf32>
    %8 = arith.truncf %7 : vector<16x128xf32> to vector<16x128xbf16>
    %c0_6 = arith.constant 0 : index
    %c0_7 = arith.constant 0 : index
    %9 = vector.load %arg4[%c0_6, %c0_7] : memref<128x128xbf16, #tpu.memory_space<vmem>>, vector<128x128xbf16>
    %cst_8 = arith.constant dense<0.000000e+00> : vector<16x128xf32>
    %10 = tpu.matmul %8, %9, %cst_8 {dimension_numbers = #tpu.dot_dimension_numbers<[1], [0], [0], [1], [0, 0, 1, 1], [], []>} : vector<16x128xbf16>, vector<128x128xbf16>, vector<16x128xf32> -> vector<16x128xf32>
    %c0_9 = arith.constant 0 : index
    %c0_10 = arith.constant 0 : index
    %11 = vector.load %arg5[%c0_9, %c0_10] : memref<1x128xf32, #tpu.memory_space<vmem>>, vector<1x128xf32>
    %12 = vector.broadcast %11 : vector<1x128xf32> to vector<16x128xf32>
    %13 = arith.addf %10, %12 : vector<16x128xf32>
    %cst_11 = arith.constant 0.000000e+00 : f32
    %14 = vector.broadcast %cst_11 : f32 to vector<16x128xf32>
    %15 = arith.maximumf %13, %14 : vector<16x128xf32>
    %16 = arith.truncf %15 : vector<16x128xf32> to vector<16x128xbf16>
    %c0_12 = arith.constant 0 : index
    %c0_13 = arith.constant 0 : index
    %17 = vector.load %arg6[%c0_12, %c0_13] : memref<128x128xbf16, #tpu.memory_space<vmem>>, vector<128x128xbf16>
    %cst_14 = arith.constant dense<0.000000e+00> : vector<16x128xf32>
    %18 = tpu.matmul %16, %17, %cst_14 {dimension_numbers = #tpu.dot_dimension_numbers<[1], [0], [0], [1], [0, 0, 1, 1], [], []>} : vector<16x128xbf16>, vector<128x128xbf16>, vector<16x128xf32> -> vector<16x128xf32>
    %c0_15 = arith.constant 0 : index
    %c0_16 = arith.constant 0 : index
    %19 = vector.load %arg7[%c0_15, %c0_16] : memref<1x128xf32, #tpu.memory_space<vmem>>, vector<1x128xf32>
    %20 = vector.broadcast %19 : vector<1x128xf32> to vector<16x128xf32>
    %21 = arith.addf %18, %20 : vector<16x128xf32>
    %c0_17 = arith.constant 0 : index
    %c0_18 = arith.constant 0 : index
    %22 = vector.load %arg8[%c0_17, %c0_18] : memref<16x128xf32, #tpu.memory_space<vmem>>, vector<16x128xf32>
    tpu.vector_store %arg8[%c0_17, %c0_18], %21 {strides = array<i32>} : memref<16x128xf32, #tpu.memory_space<vmem>>, vector<16x128xf32>,
    return
  }
  func.func @transform_0(%arg0: i32) -> (i32, i32) {
    %c0_i32 = arith.constant 0 : i32
    %c0_i32_0 = arith.constant 0 : i32
    return %arg0, %c0_i32 : i32, i32
  }
  func.func @transform_1(%arg0: i32) -> (i32, i32) {
    %c0_i32 = arith.constant 0 : i32
    %c0_i32_0 = arith.constant 0 : i32
    %c0_i32_1 = arith.constant 0 : i32
    return %c0_i32, %c0_i32_0 : i32, i32
  }
  func.func @transform_2(%arg0: i32) -> (i32, i32) {
    %c0_i32 = arith.constant 0 : i32
    %c0_i32_0 = arith.constant 0 : i32
    %c0_i32_1 = arith.constant 0 : i32
    return %c0_i32, %c0_i32_0 : i32, i32
  }
  func.func @transform_3(%arg0: i32) -> (i32, i32) {
    %c0_i32 = arith.constant 0 : i32
    %c0_i32_0 = arith.constant 0 : i32
    %c0_i32_1 = arith.constant 0 : i32
    return %c0_i32, %c0_i32_0 : i32, i32
  }
  func.func @transform_4(%arg0: i32) -> (i32, i32) {
    %c0_i32 = arith.constant 0 : i32
    %c0_i32_0 = arith.constant 0 : i32
    %c0_i32_1 = arith.constant 0 : i32
    return %c0_i32, %c0_i32_0 : i32, i32
  }
  func.func @transform_5(%arg0: i32) -> (i32, i32) {
    %c0_i32 = arith.constant 0 : i32
    %c0_i32_0 = arith.constant 0 : i32
    %c0_i32_1 = arith.constant 0 : i32
    return %c0_i32, %c0_i32_0 : i32, i32
  }
  func.func @transform_6(%arg0: i32) -> (i32, i32) {
    %c0_i32 = arith.constant 0 : i32
    %c0_i32_0 = arith.constant 0 : i32
    %c0_i32_1 = arith.constant 0 : i32
    return %c0_i32, %c0_i32_0 : i32, i32
  }
  func.func @transform_7(%arg0: i32) -> (i32, i32) {
    %c0_i32 = arith.constant 0 : i32
    %c0_i32_0 = arith.constant 0 : i32
    return %arg0, %c0_i32 : i32, i32
  }
}

</mosaic_0001>

<bundles_post_ra>
// kernel: net_forward.3
= control target key start
LH: loop header
LB: loop body
LE: loop exit
PB: predicated region body
PF: predicated region fallthrough
CT: control target
= control target key end

     0   :  { %s1450_s12 = smov 0   ;;  %s1710_s0 = inlined_call_operand.vmem [shape: bf16[2,2,16,96], index: 0, kind: input, shape index: {}]   ;;  %s1711_s1 = inlined_call_operand.vmem [shape: bf16[5,96,256], index: 1, kind: input, shape index: {}]   ;;  %s1712_s2 = inlined_call_operand.vmem [shape: f32[1,128], index: 2, kind: input, shape index: {}]   ;;  %s1713_s3 = inlined_call_operand.vmem [shape: bf16[2,14,128], index: 3, kind: output, shape index: {}]  }
   0x1 LB: > { %s1138_s13 = sadd.s32 4294967295, %s1427_s12   ;;  %p1142_p0 = scmp.ge.s32.totalorder %s1427_s12, 1  ;;  %s1427_s12 = sphi %s1450_s12, %s13_s12  }
   0x2   : > { %p137_p1 = scmp.lt.s32.totalorder %s1427_s12, 3 }
   0x4   : > { %p138_p2 = pnand %p1142_p0, %p137_p1 }
   0x5   : > { %v1325_v0 = vld [vmem:[%s1711_s1 + $0x64] ss:$8 sps:$4 sm:$0xff] (!%p138_p2)   ;;  %p161_p3 = scmp.lt.s32.totalorder (!%p138_p2), %s1138_s13, 1  ;;  %v1327_v1 = vld [vmem:[%s1711_s1 + $0x60] ss:$8 sps:$4 sm:$0xff] (!%p138_p2)   ;;  %v1429_v2 = vmov (!%p138_p2), 0  }
   0x6   : > { %141 = sbr.rel (%p138_p2) target bundleno = 353 (0x161), region = 32  ;;  %303 = vmatprep.mubr.bf16.mxu0 (!%p138_p2), %v1429_v2  ;;  %591 = vmatprep.mubr.bf16.mxu1 (!%p138_p2), %v1429_v2  ;;  %v1328_v3 = vld [vmem:[%s1711_s1 + $0x74] ss:$8 sps:$4 sm:$0xff] (!%p138_p2)   ;;  %v1330_v4 = vld [vmem:[%s1711_s1 + $0x70] ss:$8 sps:$4 sm:$0xff] (!%p138_p2)   ;;  %vm267_vm0 = vcmask (!%p138_p2), 785408  }
   0x7   : > { %271 = vmatprep.subr.bf16.mxu0 (!%p138_p2), %v1325_v0  ;;  %559 = vmatprep.subr.bf16.mxu1 (!%p138_p2), %v1325_v0  ;;  %v1331_v5 = vld [vmem:[%s1711_s1 + $0x84] ss:$8 sps:$4 sm:$0xff] (!%p138_p2)   ;;  %v1333_v6 = vld [vmem:[%s1711_s1 + $0x80] ss:$8 sps:$4 sm:$0xff] (!%p138_p2)   ;;  %v1334_v7 = vld [vmem:[%s1711_s1 + $0x94] ss:$8 sps:$4 sm:$0xff] (!%p138_p2)  }
   0x8   : > { %272 = vmatpush1.bf16.msra.mxu0 (!%p138_p2), %v1327_v1  ;;  %560 = vmatpush1.bf16.msra.mxu1 (!%p138_p2), %v1327_v1  ;;  %v1336_v8 = vld [vmem:[%s1711_s1 + $0x90] ss:$8 sps:$4 sm:$0xff] (!%p138_p2)   ;;  %v1337_v11 = vld [vmem:[%s1711_s1 + $0xa4] ss:$8 sps:$4 sm:$0xff] (!%p138_p2)   ;;  %v1339_v14 = vld [vmem:[%s1711_s1 + $0xa0] ss:$8 sps:$4 sm:$0xff] (!%p138_p2)  }
   0x9   : > { %273 = vmatprep.subr.bf16.mxu0 (!%p138_p2), %v1328_v3  ;;  %561 = vmatprep.subr.bf16.mxu1 (!%p138_p2), %v1328_v3  ;;  %v1340_v15 = vld [vmem:[%s1711_s1 + $0xb4] ss:$8 sps:$4 sm:$0xff] (!%p138_p2)   ;;  %v1342_v16 = vld [vmem:[%s1711_s1 + $0xb0] ss:$8 sps:$4 sm:$0xff] (!%p138_p2)   ;;  %v1345_v21 = vld [vmem:[%s1711_s1 + $0x4] ss:$8 sps:$4 sm:$0xff] (!%p138_p2)  }
   0xa   : > { %v1343_v24 = vld [vmem:[%s1711_s1] ss:$8 sps:$4 sm:$0xff] (!%p138_p2)   ;;  %v1352_v25 = vld [vmem:[%s1711_s1 + $0x14] ss:$8 sps:$4 sm:$0xff] (!%p138_p2)   ;;  %v1350_v26 = vld [vmem:[%s1711_s1 + $0x10] ss:$8 sps:$4 sm:$0xff] (!%p138_p2)  }
   0xb   : > { %v1355_v27 = vld [vmem:[%s1711_s1 + $0x24] ss:$8 sps:$4 sm:$0xff] (!%p138_p2)   ;;  %v1353_v28 = vld [vmem:[%s1711_s1 + $0x20] ss:$8 sps:$4 sm:$0xff] (!%p138_p2)   ;;  %v1358_v29 = vld [vmem:[%s1711_s1 + $0x34] ss:$8 sps:$4 sm:$0xff] (!%p138_p2)  }
   0xc   : > { %274 = vmatpush1.bf16.msra.mxu0 (!%p138_p2), %v1330_v4  ;;  %562 = vmatpush1.bf16.msra.mxu1 (!%p138_p2), %v1330_v4  ;;  %v1356_v30 = vld [vmem:[%s1711_s1 + $0x30] ss:$8 sps:$4 sm:$0xff] (!%p138_p2)   ;;  %v1361_v32 = vld [vmem:[%s1711_s1 + $0x44] ss:$8 sps:$4 sm:$0xff] (!%p138_p2)   ;;  %v1359_v34 = vld [vmem:[%s1711_s1 + $0x40] ss:$8 sps:$4 sm:$0xff] (!%p138_p2)  }
   0xd   : > { %s1715_s13 = smov (!%p161_p3, %s1138_s13), 1  ;;  %275 = vmatprep.subr.bf16.mxu0 %v1331_v5  ;;  %563 = vmatprep.subr.bf16.mxu1 %v1331_v5  ;;  %v1364_v35 = vld [vmem:[%s1711_s1 + $0x54] ss:$8 sps:$4 sm:$0xff]   ;;  %v1362_v36 = vld [vmem:[%s1711_s1 + $0x50] ss:$8 sps:$4 sm:$0xff]  }
   0xe   : > { %s1280_s24 = sshll.u32 %s1715_s13, 4  ;;  %v1367_v38 = vld [vmem:[%s1711_s1 + $0xc4] ss:$8 sps:$4 sm:$0xff]   ;;  %v1365_v40 = vld [vmem:[%s1711_s1 + $0xc0] ss:$8 sps:$4 sm:$0xff]   ;;  %s1281_s18 = sshll.u32 %s1715_s13, 3 }
   0xf   : > { %s1484_s29 = scalar_lea.vmem %s1710_s0, %s1280_s24  ;;  %v1371_v41 = vld [vmem:[%s1711_s1 + $0xd4] ss:$8 sps:$4 sm:$0xff]   ;;  %v1369_v42 = vld [vmem:[%s1711_s1 + $0xd0] ss:$8 sps:$4 sm:$0xff]   ;;  %v1374_v43 = vld [vmem:[%s1711_s1 + $0xe4] ss:$8 sps:$4 sm:$0xff]   ;;  %s170_s21 = scalar_lea.vmem %s1713_s3, %s1281_s18 }
  0x10   : > { %v1493_v9 = vld [vmem:[%s1484_s29] sm:$0xf]  ;;  %276 = vmatpush1.bf16.msra.mxu0 %v1333_v6  ;;  %564 = vmatpush1.bf16.msra.mxu1 %v1333_v6  ;;  %v1496_v10 = vld [vmem:[%s1484_s29 + $0x4] sm:$0xf]  ;;  %v1513_v19 = vld [vmem:[%s1484_s29 + $0x8] sm:$0xf] }
  0x11   : > { %277 = vmatprep.subr.bf16.mxu0 %v1334_v7  ;;  %565 = vmatprep.subr.bf16.mxu1 %v1334_v7  ;;  %v1201_v12 = vcombine.low %v1493_v9, %v1496_v10  ;;  %v1148_v20 = vld [vmem:[%s1484_s29 + $0xc] sm:$0x7]  ;;  %v1549_v31 = vld [vmem:[%s1484_s29] sm:$0xe]  ;;  %v173_v37 = vld [vmem:[%s1484_s29 + $0x4] sm:$0x7] }
  0x12   : > { %v1161_v22 = vcombine.low %v1513_v19, %v1148_v20  ;;  %v1257_v33 = vcombine.low %v1549_v31, %v1496_v10  ;;  %v1175_v39 = vcombine.low %v1493_v9, %v173_v37  ;;  %v1587_v44 = vld [vmem:[%s1484_s29 + $0xc] sm:$0xf]  ;;  %v1372_v45 = vld [vmem:[%s1711_s1 + $0xe0] ss:$8 sps:$4 sm:$0xff]   ;;  %v1377_v46 = vld [vmem:[%s1711_s1 + $0xf4] ss:$8 sps:$4 sm:$0xff]  }
  0x13   : > { %v445_v13 = vshll.u32 %v1201_v12, 16  ;;  %v443_v17 = vshrl.u32 %v1201_v12, 16  ;;  %v1230_v47 = vcombine.low %v1513_v19, %v1587_v44  ;;  %v1375_v48 = vld [vmem:[%s1711_s1 + $0xf0] ss:$8 sps:$4 sm:$0xff]   ;;  %v1380_v49 = vld [vmem:[%s1711_s1 + $0x104] ss:$8 sps:$4 sm:$0xff]  }
  0x14   : > { %278 = vmatpush1.bf16.msra.mxu0 %v1336_v8  ;;  %566 = vmatpush1.bf16.msra.mxu1 %v1336_v8  ;;  %v1378_v51 = vld [vmem:[%s1711_s1 + $0x100] ss:$8 sps:$4 sm:$0xff]   ;;  %v1383_v52 = vld [vmem:[%s1711_s1 + $0x114] ss:$8 sps:$4 sm:$0xff]   ;;  %v1381_v55 = vld [vmem:[%s1711_s1 + $0x110] ss:$8 sps:$4 sm:$0xff]  }
  0x15   : > { %279 = vmatprep.subr.bf16.mxu0 %v1337_v11  ;;  %567 = vmatprep.subr.bf16.mxu1 %v1337_v11  ;;  %v447_v18 = vrot.slane %v445_v13, 1  ;;  %v665_v50 = vshll.u32 %v1230_v47, 16  ;;  %v663_v53 = vshrl.u32 %v1230_v47, 16  ;;  %v1386_v56 = vld [vmem:[%s1711_s1 + $0x124] ss:$8 sps:$4 sm:$0xff]   ;;  %v843_v7 = vrot.slane %v1257_v33, 1 }
  0x16   : > { %v1384_v58 = vld [vmem:[%s1711_s1 + $0x120] ss:$8 sps:$4 sm:$0xff]   ;;  %v1389_v59 = vld [vmem:[%s1711_s1 + $0x134] ss:$8 sps:$4 sm:$0xff]   ;;  %v1387_v60 = vld [vmem:[%s1711_s1 + $0x130] ss:$8 sps:$4 sm:$0xff]  }
  0x17   : > { %v1520_v23 = vor.u32 %v447_v18, %v443_v17  ;;  %v667_v54 = vrot.slane %v665_v50, 1  ;;  %v1392_v61 = vld [vmem:[%s1711_s1 + $0x144] ss:$8 sps:$4 sm:$0xff]   ;;  %v1390_v62 = vld [vmem:[%s1711_s1 + $0x140] ss:$8 sps:$4 sm:$0xff]  }
  0x18   : > { %280 = vmatpush1.bf16.msra.mxu0 %v1339_v14  ;;  %568 = vmatpush1.bf16.msra.mxu1 %v1339_v14  ;;  %v1395_v63 = vld [vmem:[%s1711_s1 + $0x154] ss:$8 sps:$4 sm:$0xff]   ;;  %v1393_v0 = vld [vmem:[%s1711_s1 + $0x150] ss:$8 sps:$4 sm:$0xff]   ;;  %v1398_v1 = vld [vmem:[%s1711_s1 + $0x164] ss:$8 sps:$4 sm:$0xff]  }
  0x19   : > { %281 = vmatprep.subr.bf16.mxu0 %v1340_v15  ;;  %569 = vmatprep.subr.bf16.mxu1 %v1340_v15  ;;  %v668_v57 = vor.u32 %v667_v54, %v663_v53  ;;  %v1396_v3 = vld [vmem:[%s1711_s1 + $0x160] ss:$8 sps:$4 sm:$0xff]   ;;  %v1401_v4 = vld [vmem:[%s1711_s1 + $0x174] ss:$8 sps:$4 sm:$0xff]   ;;  %v1399_v5 = vld [vmem:[%s1711_s1 + $0x170] ss:$8 sps:$4 sm:$0xff]  }
  0x1a   : > { %v1404_v6 = vld [vmem:[%s1711_s1 + $0x184] ss:$8 sps:$4 sm:$0xff]   ;;  %v1402_v8 = vld [vmem:[%s1711_s1 + $0x180] ss:$8 sps:$4 sm:$0xff]   ;;  %v1408_v9 = vld [vmem:[%s1711_s1 + $0x194] ss:$8 sps:$4 sm:$0xff]  }
  0x1b   : > { %v1406_v10 = vld [vmem:[%s1711_s1 + $0x190] ss:$8 sps:$4 sm:$0xff]   ;;  %v1411_v11 = vld [vmem:[%s1711_s1 + $0x1a4] ss:$8 sps:$4 sm:$0xff]   ;;  %v1409_v12 = vld [vmem:[%s1711_s1 + $0x1a0] ss:$8 sps:$4 sm:$0xff]  }
  0x1c   : > { %282 = vmatpush1.bf16.msra.mxu0 %v1342_v16  ;;  %570 = vmatpush1.bf16.msra.mxu1 %v1342_v16  ;;  %v1414_v13 = vld [vmem:[%s1711_s1 + $0x1b4] ss:$8 sps:$4 sm:$0xff]   ;;  %v1412_v14 = vld [vmem:[%s1711_s1 + $0x1b0] ss:$8 sps:$4 sm:$0xff]   ;;  %v1272_v15 = vld [vmem:[%s1484_s29 + $0x8] sm:$0xe] }
  0x1d   : > { %382 = vmatprep.subr.bf16.mxu0 %v1345_v21  ;;  %602 = vmatprep.subr.bf16.mxu1 %v1345_v21  ;;  %v1415_v16 = vld [vmem:[%s1711_s1 + $0x1c0] ss:$8 sps:$4 sm:$0xff]   ;;  %v1420_v17 = vld [vmem:[%s1711_s1 + $0x1d4] ss:$8 sps:$4 sm:$0xff]   ;;  %v1273_v18 = vcombine.low %v1272_v15, %v1587_v44  ;;  %v1418_v19 = vld [vmem:[%s1711_s1 + $0x1d0] ss:$8 sps:$4 sm:$0xff]  }
  0x1f   : > { %1174 = vmatmul.mubr.msk.bf16.vlgmr.msra.gmra.mrb[0].mxu0 %vm267_vm0, %v1161_v22  ;;  %1215 = vmatmul.mubr.msk.bf16.vlgmr.msra.gmra.mrb[0].mxu1 %vm267_vm0, %v1520_v23  ;;  %v1005_v20 = vrot.slane %v1273_v18, 1 }
  0x20   : > { %383 = vmatpush1.bf16.msra.mxu0 %v1343_v24  ;;  %603 = vmatpush1.bf16.msra.mxu1 %v1343_v24 }
  0x21   : > { %384 = vmatprep.subr.bf16.mxu0 %v1352_v25  ;;  %604 = vmatprep.subr.bf16.mxu1 %v1352_v25 }
  0x22   : > { %414 = vmatprep.mubr.bf16.mxu0 %v1429_v2  ;;  %634 = vmatprep.mubr.bf16.mxu1 %v1429_v2 }
  0x24   : > { %385 = vmatpush1.bf16.msra.mxu0 %v1350_v26  ;;  %605 = vmatpush1.bf16.msra.mxu1 %v1350_v26 }
  0x25   : > { %386 = vmatprep.subr.bf16.mxu0 %v1355_v27  ;;  %606 = vmatprep.subr.bf16.mxu1 %v1355_v27 }
  0x28   : > { %387 = vmatpush1.bf16.msra.mxu0 %v1353_v28  ;;  %607 = vmatpush1.bf16.msra.mxu1 %v1353_v28 }
  0x29   : > { %388 = vmatprep.subr.bf16.mxu0 %v1358_v29  ;;  %608 = vmatprep.subr.bf16.mxu1 %v1358_v29  ;;  %v1275_v29 = vld [vmem:[%s1712_s2] ss:$0 sm:$0xff] }
  0x2c   : > { %389 = vmatpush1.bf16.msra.mxu0 %v1356_v30  ;;  %609 = vmatpush1.bf16.msra.mxu1 %v1356_v30 }
  0x2d   : > { %390 = vmatprep.subr.bf16.mxu0 %v1361_v32  ;;  %610 = vmatprep.subr.bf16.mxu1 %v1361_v32 }
  0x30   : > { %391 = vmatpush1.bf16.msra.mxu0 %v1359_v34  ;;  %611 = vmatpush1.bf16.msra.mxu1 %v1359_v34 }
  0x31   : > { %392 = vmatprep.subr.bf16.mxu0 %v1364_v35  ;;  %612 = vmatprep.subr.bf16.mxu1 %v1364_v35 }
  0x34   : > { %393 = vmatpush1.bf16.msra.mxu0 %v1362_v36  ;;  %613 = vmatpush1.bf16.msra.mxu1 %v1362_v36 }
  0x35   : > { %512 = vmatprep.subr.bf16.mxu0 %v1367_v38  ;;  %779 = vmatprep.subr.bf16.mxu1 %v1367_v38 }
  0x37   : > { %1188 = vmatmul.mubr.msk.bf16.vlgmr.msra.gmra.mrb[0].mxu0 %vm267_vm0, %v1175_v39  ;;  %1216 = vmatmul.mubr.msk.bf16.vlgmr.msra.gmra.mrb[0].mxu1 %vm267_vm0, %v1161_v22 }
  0x38   : > { %513 = vmatpush1.bf16.msra.mxu0 %v1365_v40  ;;  %780 = vmatpush1.bf16.msra.mxu1 %v1365_v40 }
  0x39   : > { %514 = vmatprep.subr.bf16.mxu0 %v1371_v41  ;;  %781 = vmatprep.subr.bf16.mxu1 %v1371_v41 }
  0x3a   : > { %544 = vmatprep.mubr.bf16.mxu0 %v1429_v2  ;;  %811 = vmatprep.mubr.bf16.mxu1 %v1429_v2 }
  0x3c   : > { %515 = vmatpush1.bf16.msra.mxu0 %v1369_v42  ;;  %782 = vmatpush1.bf16.msra.mxu1 %v1369_v42 }
  0x3d   : > { %516 = vmatprep.subr.bf16.mxu0 %v1374_v43  ;;  %783 = vmatprep.subr.bf16.mxu1 %v1374_v43 }
  0x40   : > { %517 = vmatpush1.bf16.msra.mxu0 %v1372_v45  ;;  %784 = vmatpush1.bf16.msra.mxu1 %v1372_v45 }
  0x41   : > { %518 = vmatprep.subr.bf16.mxu0 %v1377_v46  ;;  %785 = vmatprep.subr.bf16.mxu1 %v1377_v46 }
  0x44   : > { %519 = vmatpush1.bf16.msra.mxu0 %v1375_v48  ;;  %786 = vmatpush1.bf16.msra.mxu1 %v1375_v48 }
  0x45   : > { %520 = vmatprep.subr.bf16.mxu0 %v1380_v49  ;;  %787 = vmatprep.subr.bf16.mxu1 %v1380_v49 }
  0x48   : > { %521 = vmatpush1.bf16.msra.mxu0 %v1378_v51  ;;  %788 = vmatpush1.bf16.msra.mxu1 %v1378_v51 }
  0x49   : > { %522 = vmatprep.subr.bf16.mxu0 %v1383_v52  ;;  %789 = vmatprep.subr.bf16.mxu1 %v1383_v52 }
  0x4c   : > { %523 = vmatpush1.bf16.msra.mxu0 %v1381_v55  ;;  %790 = vmatpush1.bf16.msra.mxu1 %v1381_v55 }
  0x4d   : > { %732 = vmatprep.subr.bf16.mxu0 %v1386_v56  ;;  %954 = vmatprep.subr.bf16.mxu1 %v1386_v56 }
  0x4f   : > { %1214 = vmatmul.mubr.msk.bf16.vlgmr.msra.gmra.mrb[0].mxu0 %vm267_vm0, %v1520_v23  ;;  %1244 = vmatmul.mubr.msk.bf16.vlgmr.msra.gmra.mrb[0].mxu1 %vm267_vm0, %v668_v57 }
  0x50   : > { %733 = vmatpush1.bf16.msra.mxu0 %v1384_v58  ;;  %955 = vmatpush1.bf16.msra.mxu1 %v1384_v58 }
  0x51   : > { %734 = vmatprep.subr.bf16.mxu0 %v1389_v59  ;;  %956 = vmatprep.subr.bf16.mxu1 %v1389_v59 }
  0x52   : > { %764 = vmatprep.mubr.bf16.mxu0 %v1429_v2  ;;  %986 = vmatprep.mubr.bf16.mxu1 %v1429_v2 }
  0x54   : > { %735 = vmatpush1.bf16.msra.mxu0 %v1387_v60  ;;  %957 = vmatpush1.bf16.msra.mxu1 %v1387_v60 }
  0x55   : > { %736 = vmatprep.subr.bf16.mxu0 %v1392_v61  ;;  %958 = vmatprep.subr.bf16.mxu1 %v1392_v61 }
  0x58   : > { %737 = vmatpush1.bf16.msra.mxu0 %v1390_v62  ;;  %959 = vmatpush1.bf16.msra.mxu1 %v1390_v62 }
  0x59   : > { %738 = vmatprep.subr.bf16.mxu0 %v1395_v63  ;;  %960 = vmatprep.subr.bf16.mxu1 %v1395_v63 }
  0x5c   : > { %739 = vmatpush1.bf16.msra.mxu0 %v1393_v0  ;;  %961 = vmatpush1.bf16.msra.mxu1 %v1393_v0 }
  0x5d   : > { %740 = vmatprep.subr.bf16.mxu0 %v1398_v1  ;;  %962 = vmatprep.subr.bf16.mxu1 %v1398_v1 }
  0x60   : > { %741 = vmatpush1.bf16.msra.mxu0 %v1396_v3  ;;  %963 = vmatpush1.bf16.msra.mxu1 %v1396_v3 }
  0x61   : > { %742 = vmatprep.subr.bf16.mxu0 %v1401_v4  ;;  %964 = vmatprep.subr.bf16.mxu1 %v1401_v4 }
  0x64   : > { %743 = vmatpush1.bf16.msra.mxu0 %v1399_v5  ;;  %965 = vmatpush1.bf16.msra.mxu1 %v1399_v5 }
  0x65   : > { %907 = vmatprep.subr.bf16.mxu0 %v1404_v6  ;;  %1009 = vmatprep.subr.bf16.mxu1 %v1404_v6 }
  0x67   : > { %1243 = vmatmul.mubr.msk.bf16.vlgmr.msra.gmra.mrb[0].mxu0 %vm267_vm0, %v668_v57  ;;  %1271 = vmatmul.mubr.msk.bf16.vlgmr.msra.gmra.mrb[0].mxu1 %vm267_vm0, %v843_v7 }
  0x68   : > { %908 = vmatpush1.bf16.msra.mxu0 %v1402_v8  ;;  %1010 = vmatpush1.bf16.msra.mxu1 %v1402_v8 }
  0x69   : > { %909 = vmatprep.subr.bf16.mxu0 %v1408_v9  ;;  %1011 = vmatprep.subr.bf16.mxu1 %v1408_v9 }
  0x6a   : > { %939 = vmatprep.mubr.bf16.mxu0 %v1429_v2  ;;  %1041 = vmatprep.mubr.bf16.mxu1 %v1429_v2  ;;  %v1417_v2 = vld [vmem:[%s1711_s1 + $0x1c4] ss:$8 sps:$4 sm:$0xff]  }
  0x6c   : > { %910 = vmatpush1.bf16.msra.mxu0 %v1406_v10  ;;  %1012 = vmatpush1.bf16.msra.mxu1 %v1406_v10 }
  0x6d   : > { %911 = vmatprep.subr.bf16.mxu0 %v1411_v11  ;;  %1013 = vmatprep.subr.bf16.mxu1 %v1411_v11 }
  0x70   : > { %912 = vmatpush1.bf16.msra.mxu0 %v1409_v12  ;;  %1014 = vmatpush1.bf16.msra.mxu1 %v1409_v12 }
  0x71   : > { %913 = vmatprep.subr.bf16.mxu0 %v1414_v13  ;;  %1015 = vmatprep.subr.bf16.mxu1 %v1414_v13 }
  0x74   : > { %914 = vmatpush1.bf16.msra.mxu0 %v1412_v14  ;;  %1016 = vmatpush1.bf16.msra.mxu1 %v1412_v14 }
  0x75   : > { %915 = vmatprep.subr.bf16.mxu0 %v1417_v2  ;;  %1017 = vmatprep.subr.bf16.mxu1 %v1417_v2 }
  0x78   : > { %916 = vmatpush1.bf16.msra.mxu0 %v1415_v16  ;;  %1018 = vmatpush1.bf16.msra.mxu1 %v1415_v16 }
  0x79   : > { %917 = vmatprep.subr.bf16.mxu0 %v1420_v17  ;;  %1019 = vmatprep.subr.bf16.mxu1 %v1420_v17 }
  0x7c   : > { %918 = vmatpush1.bf16.msra.mxu0 %v1418_v19  ;;  %1020 = vmatpush1.bf16.msra.mxu1 %v1418_v19 }
  0x7f   : > { %1270 = vmatmul.mubr.msk.bf16.vlgmr.msra.gmra.mrb[0].mxu0 %vm267_vm0, %v843_v7  ;;  %1274 = vmatmul.mubr.msk.bf16.vlgmr.msra.gmra.mrb[0].mxu1 %vm267_vm0, %v1005_v20 }
 0x152   : > { %v941_v21 = vpop.f32.mrb[0].mxu0  ;;  %v1043_v22 = vpop.f32.mrb[0].mxu1 }
 0x153   : > { %v943_v23 = vpop.f32.mrb[1].mxu0  ;;  %v1045_v24 = vpop.f32.mrb[1].mxu1 }
 0x154   : > { %v1056_v25 = vmax.f32 %v941_v21, %v943_v23  ;;  %v1058_v26 = vmax.f32 %v1043_v22, %v1045_v24  ;;  %v945_v27 = vpop.f32.mrb[2].mxu0  ;;  %v1047_v28 = vpop.f32.mrb[2].mxu1 }
 0x155   : > { %v947_v30 = vpop.f32.mrb[3].mxu0  ;;  %v1049_v31 = vpop.f32.mrb[3].mxu1 }
 0x156   : > { %v1060_v32 = vmax.f32 %v1056_v25, %v1058_v26  ;;  %v1057_v33 = vmax.f32 %v945_v27, %v947_v30  ;;  %v1059_v34 = vmax.f32 %v1047_v28, %v1049_v31 }
 0x158   : > { %v1069_v35 = vadd.f32 %v1275_v29, %v1060_v32  ;;  %v1061_v36 = vmax.f32 %v1057_v33, %v1059_v34 }
 0x15a   : > { %v1071_v37 = vmax.f32 %v1069_v35, 0.0  ;;  %v1070_v38 = vadd.f32 %v1275_v29, %v1061_v36 }
 0x15c   : > { %v1282_v39 = vpack.c.bf16 %v1071_v37, %v1071_v37  ;;  %v1072_v40 = vmax.f32 %v1070_v38, 0.0 }
 0x15e   : > { %1081 = vst [vmem:[%s170_s21] sm:$0xf] %v1282_v39  ;;  %v1283_v41 = vpack.c.bf16 %v1072_v40, %v1072_v40 }
 0x160   : > { %1082 = vst [vmem:[%s170_s21 + $0x4] sm:$0x7] %v1283_v41 }
 0x161 PF: > { %s13_s12 = sadd.s32 1, %s1427_s12  }
 0x162   : > { %p10_p4 = scmp.ge.s32.totalorder %s13_s12, 4  }
 0x164   :  { %12 = sbr.rel (!%p10_p4) target bundleno = 1 (0x1), region = 67 }

// kernel: net_forward.4
= control target key start
LH: loop header
LB: loop body
LE: loop exit
PB: predicated region body
PF: predicated region fallthrough
CT: control target
= control target key end

     0   :  { %s1541_s12 = smov 0   ;;  %s1839_s0 = inlined_call_operand.vmem [shape: bf16[2,2,7,128], index: 0, kind: input, shape index: {}]   ;;  %s1840_s1 = inlined_call_operand.vmem [shape: bf16[5,128,256], index: 1, kind: input, shape index: {}]   ;;  %s1841_s2 = inlined_call_operand.vmem [shape: f32[1,128], index: 2, kind: input, shape index: {}]   ;;  %s1842_s3 = inlined_call_operand.vmem [shape: bf16[2,5,128], index: 3, kind: output, shape index: {}]  }
   0x1 LB: > { %s1185_s13 = sadd.s32 4294967295, %s1518_s12   ;;  %p1189_p0 = scmp.ge.s32.totalorder %s1518_s12, 1  ;;  %s1518_s12 = sphi %s1541_s12, %s13_s12  }
   0x2   : > { %p137_p1 = scmp.lt.s32.totalorder %s1518_s12, 3 }
   0x4   : > { %p138_p2 = pnand %p1189_p0, %p137_p1 }
   0x5   : > { %v1388_v0 = vld [vmem:[%s1840_s1 + $0x84] ss:$8 sps:$4 sm:$0xff] (!%p138_p2)   ;;  %v1390_v1 = vld [vmem:[%s1840_s1 + $0x80] ss:$8 sps:$4 sm:$0xff] (!%p138_p2)   ;;  %v1520_v2 = vmov (!%p138_p2), 0   ;;  %p160_p3 = scmp.lt.s32.totalorder (!%p138_p2), %s1185_s13, 1 }
   0x6   : > { %141 = sbr.rel (%p138_p2) target bundleno = 392 (0x188), region = 32  ;;  %318 = vmatprep.mubr.bf16.mxu0 (!%p138_p2), %v1520_v2  ;;  %631 = vmatprep.mubr.bf16.mxu1 (!%p138_p2), %v1520_v2  ;;  %v1391_v3 = vld [vmem:[%s1840_s1 + $0x94] ss:$8 sps:$4 sm:$0xff] (!%p138_p2)   ;;  %v1393_v4 = vld [vmem:[%s1840_s1 + $0x90] ss:$8 sps:$4 sm:$0xff] (!%p138_p2)   ;;  %vm1126_vm0 = vcmask (!%p138_p2), 1042432  }
   0x7   : > { %286 = vmatprep.subr.bf16.mxu0 (!%p138_p2), %v1388_v0  ;;  %599 = vmatprep.subr.bf16.mxu1 (!%p138_p2), %v1388_v0  ;;  %v1394_v5 = vld [vmem:[%s1840_s1 + $0xa4] ss:$8 sps:$4 sm:$0xff] (!%p138_p2)   ;;  %v1396_v6 = vld [vmem:[%s1840_s1 + $0xa0] ss:$8 sps:$4 sm:$0xff] (!%p138_p2)   ;;  %v1397_v7 = vld [vmem:[%s1840_s1 + $0xb4] ss:$8 sps:$4 sm:$0xff] (!%p138_p2)  }
   0x8   : > { %287 = vmatpush1.bf16.msra.mxu0 (!%p138_p2), %v1390_v1  ;;  %600 = vmatpush1.bf16.msra.mxu1 (!%p138_p2), %v1390_v1  ;;  %v1399_v8 = vld [vmem:[%s1840_s1 + $0xb0] ss:$8 sps:$4 sm:$0xff] (!%p138_p2)   ;;  %v1400_v9 = vld [vmem:[%s1840_s1 + $0xc4] ss:$8 sps:$4 sm:$0xff] (!%p138_p2)   ;;  %v1402_v10 = vld [vmem:[%s1840_s1 + $0xc0] ss:$8 sps:$4 sm:$0xff] (!%p138_p2)  }
   0x9   : > { %288 = vmatprep.subr.bf16.mxu0 (!%p138_p2), %v1391_v3  ;;  %601 = vmatprep.subr.bf16.mxu1 (!%p138_p2), %v1391_v3  ;;  %v1403_v12 = vld [vmem:[%s1840_s1 + $0xd4] ss:$8 sps:$4 sm:$0xff] (!%p138_p2)   ;;  %v1405_v14 = vld [vmem:[%s1840_s1 + $0xd0] ss:$8 sps:$4 sm:$0xff] (!%p138_p2)   ;;  %v1406_v15 = vld [vmem:[%s1840_s1 + $0xe4] ss:$8 sps:$4 sm:$0xff] (!%p138_p2)  }
   0xa   : > { %v1408_v17 = vld [vmem:[%s1840_s1 + $0xe0] ss:$8 sps:$4 sm:$0xff] (!%p138_p2)   ;;  %v1409_v18 = vld [vmem:[%s1840_s1 + $0xf4] ss:$8 sps:$4 sm:$0xff] (!%p138_p2)   ;;  %v1411_v21 = vld [vmem:[%s1840_s1 + $0xf0] ss:$8 sps:$4 sm:$0xff] (!%p138_p2)  }
   0xb   : > { %v1414_v22 = vld [vmem:[%s1840_s1 + $0x4] ss:$8 sps:$4 sm:$0xff] (!%p138_p2)   ;;  %v1412_v23 = vld [vmem:[%s1840_s1] ss:$8 sps:$4 sm:$0xff] (!%p138_p2)   ;;  %v1419_v26 = vld [vmem:[%s1840_s1 + $0x14] ss:$8 sps:$4 sm:$0xff] (!%p138_p2)  }
   0xc   : > { %289 = vmatpush1.bf16.msra.mxu0 (!%p138_p2), %v1393_v4  ;;  %602 = vmatpush1.bf16.msra.mxu1 (!%p138_p2), %v1393_v4  ;;  %v1417_v27 = vld [vmem:[%s1840_s1 + $0x10] ss:$8 sps:$4 sm:$0xff] (!%p138_p2)   ;;  %v1422_v28 = vld [vmem:[%s1840_s1 + $0x24] ss:$8 sps:$4 sm:$0xff] (!%p138_p2)   ;;  %v1420_v29 = vld [vmem:[%s1840_s1 + $0x20] ss:$8 sps:$4 sm:$0xff] (!%p138_p2)  }
   0xd   : > { %s1844_s13 = smov (!%p160_p3, %s1185_s13), 1  ;;  %290 = vmatprep.subr.bf16.mxu0 %v1394_v5  ;;  %603 = vmatprep.subr.bf16.mxu1 %v1394_v5  ;;  %v1425_v30 = vld [vmem:[%s1840_s1 + $0x34] ss:$8 sps:$4 sm:$0xff]   ;;  %v1423_v31 = vld [vmem:[%s1840_s1 + $0x30] ss:$8 sps:$4 sm:$0xff]  }
   0xe   : > { %s1346_s28 = sshll.u32 %s1844_s13, 3  ;;  %v1428_v32 = vld [vmem:[%s1840_s1 + $0x44] ss:$8 sps:$4 sm:$0xff]   ;;  %v1426_v33 = vld [vmem:[%s1840_s1 + $0x40] ss:$8 sps:$4 sm:$0xff]  }
   0xf   : > { %s1584_s8 = scalar_lea.vmem %s1839_s0, %s1346_s28  ;;  %v1431_v34 = vld [vmem:[%s1840_s1 + $0x54] ss:$8 sps:$4 sm:$0xff]   ;;  %v1429_v35 = vld [vmem:[%s1840_s1 + $0x50] ss:$8 sps:$4 sm:$0xff]   ;;  %v1434_v36 = vld [vmem:[%s1840_s1 + $0x64] ss:$8 sps:$4 sm:$0xff]  }
  0x10   : > { %291 = vmatpush1.bf16.msra.mxu0 %v1396_v6  ;;  %604 = vmatpush1.bf16.msra.mxu1 %v1396_v6  ;;  %v1590_v11 = vld [vmem:[%s1584_s8] sm:$0x7]  ;;  %v1621_v25 = vld [vmem:[%s1584_s8 + $0x4] sm:$0x7]  ;;  %v1437_v38 = vld [vmem:[%s1840_s1 + $0x74] ss:$8 sps:$4 sm:$0xff]  }
  0x11   : > { %292 = vmatprep.subr.bf16.mxu0 %v1397_v7  ;;  %605 = vmatprep.subr.bf16.mxu1 %v1397_v7  ;;  %v1258_v13 = vcombine.low %v1590_v11, %v1590_v11  ;;  %v1432_v37 = vld [vmem:[%s1840_s1 + $0x60] ss:$8 sps:$4 sm:$0xff]   ;;  %v1435_v39 = vld [vmem:[%s1840_s1 + $0x70] ss:$8 sps:$4 sm:$0xff]   ;;  %v1440_v40 = vld [vmem:[%s1840_s1 + $0x104] ss:$8 sps:$4 sm:$0xff]   ;;  %v1291_v51 = vcombine.low %v1621_v25, %v1621_v25 }
  0x12   : > { %v1438_v41 = vld [vmem:[%s1840_s1 + $0x100] ss:$8 sps:$4 sm:$0xff]   ;;  %v1443_v42 = vld [vmem:[%s1840_s1 + $0x114] ss:$8 sps:$4 sm:$0xff]   ;;  %v1441_v43 = vld [vmem:[%s1840_s1 + $0x110] ss:$8 sps:$4 sm:$0xff]  }
  0x13   : > { %v471_v16 = vshll.u32 %v1258_v13, 16  ;;  %v469_v19 = vshrl.u32 %v1258_v13, 16  ;;  %v1446_v44 = vld [vmem:[%s1840_s1 + $0x124] ss:$8 sps:$4 sm:$0xff]   ;;  %v1444_v45 = vld [vmem:[%s1840_s1 + $0x120] ss:$8 sps:$4 sm:$0xff]  }
  0x14   : > { %293 = vmatpush1.bf16.msra.mxu0 %v1399_v8  ;;  %606 = vmatpush1.bf16.msra.mxu1 %v1399_v8  ;;  %v1449_v46 = vld [vmem:[%s1840_s1 + $0x134] ss:$8 sps:$4 sm:$0xff]   ;;  %v1447_v47 = vld [vmem:[%s1840_s1 + $0x130] ss:$8 sps:$4 sm:$0xff]   ;;  %v1452_v48 = vld [vmem:[%s1840_s1 + $0x144] ss:$8 sps:$4 sm:$0xff]  }
  0x15   : > { %294 = vmatprep.subr.bf16.mxu0 %v1400_v9  ;;  %607 = vmatprep.subr.bf16.mxu1 %v1400_v9  ;;  %v473_v20 = vrot.slane %v471_v16, 1  ;;  %v1450_v49 = vld [vmem:[%s1840_s1 + $0x140] ss:$8 sps:$4 sm:$0xff]   ;;  %v1455_v50 = vld [vmem:[%s1840_s1 + $0x154] ss:$8 sps:$4 sm:$0xff]   ;;  %v704_v54 = vshll.u32 %v1291_v51, 16 }
  0x16   : > { %v1453_v52 = vld [vmem:[%s1840_s1 + $0x150] ss:$8 sps:$4 sm:$0xff]   ;;  %v1458_v53 = vld [vmem:[%s1840_s1 + $0x164] ss:$8 sps:$4 sm:$0xff]   ;;  %v1456_v55 = vld [vmem:[%s1840_s1 + $0x160] ss:$8 sps:$4 sm:$0xff]  }
  0x17   : > { %v1618_v24 = vor.u32 %v473_v20, %v469_v19  ;;  %v1461_v56 = vld [vmem:[%s1840_s1 + $0x174] ss:$8 sps:$4 sm:$0xff]   ;;  %v702_v57 = vshrl.u32 %v1291_v51, 16  ;;  %v706_v58 = vrot.slane %v704_v54, 1  ;;  %v1459_v59 = vld [vmem:[%s1840_s1 + $0x170] ss:$8 sps:$4 sm:$0xff]  }
  0x18   : > { %295 = vmatpush1.bf16.msra.mxu0 %v1402_v10  ;;  %608 = vmatpush1.bf16.msra.mxu1 %v1402_v10  ;;  %v1464_v60 = vld [vmem:[%s1840_s1 + $0x184] ss:$8 sps:$4 sm:$0xff]   ;;  %v1462_v62 = vld [vmem:[%s1840_s1 + $0x180] ss:$8 sps:$4 sm:$0xff]   ;;  %v1467_v63 = vld [vmem:[%s1840_s1 + $0x194] ss:$8 sps:$4 sm:$0xff]  }
  0x19   : > { %296 = vmatprep.subr.bf16.mxu0 %v1403_v12  ;;  %609 = vmatprep.subr.bf16.mxu1 %v1403_v12  ;;  %v707_v61 = vor.u32 %v706_v58, %v702_v57  ;;  %v1465_v0 = vld [vmem:[%s1840_s1 + $0x190] ss:$8 sps:$4 sm:$0xff]   ;;  %v1470_v1 = vld [vmem:[%s1840_s1 + $0x1a4] ss:$8 sps:$4 sm:$0xff]   ;;  %v1468_v3 = vld [vmem:[%s1840_s1 + $0x1a0] ss:$8 sps:$4 sm:$0xff]  }
  0x1a   : > { %v1473_v4 = vld [vmem:[%s1840_s1 + $0x1b4] ss:$8 sps:$4 sm:$0xff]   ;;  %v1471_v5 = vld [vmem:[%s1840_s1 + $0x1b0] ss:$8 sps:$4 sm:$0xff]   ;;  %v1476_v6 = vld [vmem:[%s1840_s1 + $0x1c4] ss:$8 sps:$4 sm:$0xff]  }
  0x1b   : > { %v1474_v7 = vld [vmem:[%s1840_s1 + $0x1c0] ss:$8 sps:$4 sm:$0xff]   ;;  %v1479_v8 = vld [vmem:[%s1840_s1 + $0x1d4] ss:$8 sps:$4 sm:$0xff]   ;;  %v1477_v9 = vld [vmem:[%s1840_s1 + $0x1d0] ss:$8 sps:$4 sm:$0xff]  }
  0x1c   : > { %297 = vmatpush1.bf16.msra.mxu0 %v1405_v14  ;;  %610 = vmatpush1.bf16.msra.mxu1 %v1405_v14  ;;  %v1482_v10 = vld [vmem:[%s1840_s1 + $0x1e4] ss:$8 sps:$4 sm:$0xff]   ;;  %v1485_v12 = vld [vmem:[%s1840_s1 + $0x1f4] ss:$8 sps:$4 sm:$0xff]   ;;  %v1483_v14 = vld [vmem:[%s1840_s1 + $0x1f0] ss:$8 sps:$4 sm:$0xff]  }
  0x1d   : > { %298 = vmatprep.subr.bf16.mxu0 %v1406_v15  ;;  %611 = vmatprep.subr.bf16.mxu1 %v1406_v15  ;;  %v1772_v13 = vld [vmem:[%s1584_s8] ss:$0 sps:$4 sm:$0xee]   ;;  %v1488_v15 = vld [vmem:[%s1840_s1 + $0x204] ss:$8 sps:$4 sm:$0xff]  }
  0x1e   : > { %v896_v16 = vrot.slane %v1772_v13, 1  ;;  %v1490_v19 = vld [vmem:[%s1840_s1 + $0x210] ss:$8 sps:$4 sm:$0xff]   ;;  %v1495_v20 = vld [vmem:[%s1840_s1 + $0x224] ss:$8 sps:$4 sm:$0xff]  }
  0x1f   : > { %vm1127_vm1 = vsmask.f32 2304 }
  0x20   : > { %299 = vmatpush1.bf16.msra.mxu0 %v1408_v17  ;;  %612 = vmatpush1.bf16.msra.mxu1 %v1408_v17  ;;  %v1486_v17 = vld [vmem:[%s1840_s1 + $0x200] ss:$8 sps:$4 sm:$0xff]   ;;  %vm1128_vm2 = vmand %vm1126_vm0, %vm1127_vm1 }
  0x21   : > { %300 = vmatprep.subr.bf16.mxu0 %v1409_v18  ;;  %613 = vmatprep.subr.bf16.mxu1 %v1409_v18  ;;  %v1492_v18 = vld [vmem:[%s1840_s1 + $0x214] ss:$8 sps:$4 sm:$0xff]  }
  0x24   : > { %301 = vmatpush1.bf16.msra.mxu0 %v1411_v21  ;;  %614 = vmatpush1.bf16.msra.mxu1 %v1411_v21  ;;  %v1493_v21 = vld [vmem:[%s1840_s1 + $0x220] ss:$8 sps:$4 sm:$0xff]  }
  0x25   : > { %407 = vmatprep.subr.bf16.mxu0 %v1414_v22  ;;  %640 = vmatprep.subr.bf16.mxu1 %v1414_v22  ;;  %v1498_v22 = vld [vmem:[%s1840_s1 + $0x234] ss:$8 sps:$4 sm:$0xff]  }
  0x27   : > { %319 = vmatmul.mubr.bf16.vlgmr.msra.gmra.mrb[0].mxu0 %v1621_v25  ;;  %632 = vmatmul.mubr.bf16.vlgmr.msra.gmra.mrb[0].mxu1 %v1618_v24 }
  0x28   : > { %408 = vmatpush1.bf16.msra.mxu0 %v1412_v23  ;;  %641 = vmatpush1.bf16.msra.mxu1 %v1412_v23  ;;  %v1496_v23 = vld [vmem:[%s1840_s1 + $0x230] ss:$8 sps:$4 sm:$0xff]  }
  0x29   : > { %409 = vmatprep.subr.bf16.mxu0 %v1419_v26  ;;  %642 = vmatprep.subr.bf16.mxu1 %v1419_v26  ;;  %v1502_v26 = vld [vmem:[%s1840_s1 + $0x250] ss:$8 sps:$4 sm:$0xff]  }
  0x2a   : > { %439 = vmatprep.mubr.bf16.mxu0 %v1520_v2  ;;  %672 = vmatprep.mubr.bf16.mxu1 %v1520_v2 }
  0x2c   : > { %410 = vmatpush1.bf16.msra.mxu0 %v1417_v27  ;;  %643 = vmatpush1.bf16.msra.mxu1 %v1417_v27  ;;  %v1507_v27 = vld [vmem:[%s1840_s1 + $0x264] ss:$8 sps:$4 sm:$0xff]  }
  0x2d   : > { %411 = vmatprep.subr.bf16.mxu0 %v1422_v28  ;;  %644 = vmatprep.subr.bf16.mxu1 %v1422_v28  ;;  %v1505_v28 = vld [vmem:[%s1840_s1 + $0x260] ss:$8 sps:$4 sm:$0xff]  }
  0x30   : > { %412 = vmatpush1.bf16.msra.mxu0 %v1420_v29  ;;  %645 = vmatpush1.bf16.msra.mxu1 %v1420_v29  ;;  %v1510_v29 = vld [vmem:[%s1840_s1 + $0x274] ss:$8 sps:$4 sm:$0xff]  }
  0x31   : > { %413 = vmatprep.subr.bf16.mxu0 %v1425_v30  ;;  %646 = vmatprep.subr.bf16.mxu1 %v1425_v30  ;;  %v1511_v30 = vld [vmem:[%s1584_s8 + $0x4] ss:$0 sps:$4 sm:$0xee]   ;;  %s1192_s8 = sshll.u32 %s1844_s13, 2 }
  0x32   : > { %s168_s11 = scalar_lea.vmem %s1842_s3, %s1192_s8 }
  0x34   : > { %414 = vmatpush1.bf16.msra.mxu0 %v1423_v31  ;;  %647 = vmatpush1.bf16.msra.mxu1 %v1423_v31  ;;  %v1508_v31 = vld [vmem:[%s1840_s1 + $0x270] ss:$8 sps:$4 sm:$0xff]  }
  0x35   : > { %415 = vmatprep.subr.bf16.mxu0 %v1428_v32  ;;  %648 = vmatprep.subr.bf16.mxu1 %v1428_v32  ;;  %v1068_v32 = vrot.slane %v1511_v30, 1 }
  0x38   : > { %416 = vmatpush1.bf16.msra.mxu0 %v1426_v33  ;;  %649 = vmatpush1.bf16.msra.mxu1 %v1426_v33 }
  0x39   : > { %417 = vmatprep.subr.bf16.mxu0 %v1431_v34  ;;  %650 = vmatprep.subr.bf16.mxu1 %v1431_v34 }
  0x3c   : > { %418 = vmatpush1.bf16.msra.mxu0 %v1429_v35  ;;  %651 = vmatpush1.bf16.msra.mxu1 %v1429_v35 }
  0x3d   : > { %419 = vmatprep.subr.bf16.mxu0 %v1434_v36  ;;  %652 = vmatprep.subr.bf16.mxu1 %v1434_v36 }
  0x40   : > { %420 = vmatpush1.bf16.msra.mxu0 %v1432_v37  ;;  %653 = vmatpush1.bf16.msra.mxu1 %v1432_v37 }
  0x41   : > { %421 = vmatprep.subr.bf16.mxu0 %v1437_v38  ;;  %654 = vmatprep.subr.bf16.mxu1 %v1437_v38 }
  0x44   : > { %422 = vmatpush1.bf16.msra.mxu0 %v1435_v39  ;;  %655 = vmatpush1.bf16.msra.mxu1 %v1435_v39 }
  0x45   : > { %556 = vmatprep.subr.bf16.mxu0 %v1440_v40  ;;  %832 = vmatprep.subr.bf16.mxu1 %v1440_v40 }
  0x47   : > { %440 = vmatmul.mubr.bf16.vlgmr.msra.gmra.mrb[0].mxu0 %v1590_v11  ;;  %673 = vmatmul.mubr.bf16.vlgmr.msra.gmra.mrb[0].mxu1 %v1621_v25  ;;  %v1480_v11 = vld [vmem:[%s1840_s1 + $0x1e0] ss:$8 sps:$4 sm:$0xff]   ;;  %v1504_v25 = vld [vmem:[%s1840_s1 + $0x254] ss:$8 sps:$4 sm:$0xff]  }
  0x48   : > { %557 = vmatpush1.bf16.msra.mxu0 %v1438_v41  ;;  %833 = vmatpush1.bf16.msra.mxu1 %v1438_v41  ;;  %v1343_v41 = vld [vmem:[%s1841_s2] ss:$0 sm:$0xff] }
  0x49   : > { %558 = vmatprep.subr.bf16.mxu0 %v1443_v42  ;;  %834 = vmatprep.subr.bf16.mxu1 %v1443_v42 }
  0x4a   : > { %588 = vmatprep.mubr.bf16.mxu0 %v1520_v2  ;;  %864 = vmatprep.mubr.bf16.mxu1 %v1520_v2 }
  0x4c   : > { %559 = vmatpush1.bf16.msra.mxu0 %v1441_v43  ;;  %835 = vmatpush1.bf16.msra.mxu1 %v1441_v43 }
  0x4d   : > { %560 = vmatprep.subr.bf16.mxu0 %v1446_v44  ;;  %836 = vmatprep.subr.bf16.mxu1 %v1446_v44 }
  0x50   : > { %561 = vmatpush1.bf16.msra.mxu0 %v1444_v45  ;;  %837 = vmatpush1.bf16.msra.mxu1 %v1444_v45 }
  0x51   : > { %562 = vmatprep.subr.bf16.mxu0 %v1449_v46  ;;  %838 = vmatprep.subr.bf16.mxu1 %v1449_v46 }
  0x54   : > { %563 = vmatpush1.bf16.msra.mxu0 %v1447_v47  ;;  %839 = vmatpush1.bf16.msra.mxu1 %v1447_v47  ;;  %v1129_v47 = vld [vmem:[%s168_s11] sm:$0x7] }
  0x55   : > { %564 = vmatprep.subr.bf16.mxu0 %v1452_v48  ;;  %840 = vmatprep.subr.bf16.mxu1 %v1452_v48 }
  0x58   : > { %565 = vmatpush1.bf16.msra.mxu0 %v1450_v49  ;;  %841 = vmatpush1.bf16.msra.mxu1 %v1450_v49 }
  0x59   : > { %566 = vmatprep.subr.bf16.mxu0 %v1455_v50  ;;  %842 = vmatprep.subr.bf16.mxu1 %v1455_v50 }
  0x5c   : > { %567 = vmatpush1.bf16.msra.mxu0 %v1453_v52  ;;  %843 = vmatpush1.bf16.msra.mxu1 %v1453_v52 }
  0x5d   : > { %568 = vmatprep.subr.bf16.mxu0 %v1458_v53  ;;  %844 = vmatprep.subr.bf16.mxu1 %v1458_v53 }
  0x60   : > { %569 = vmatpush1.bf16.msra.mxu0 %v1456_v55  ;;  %845 = vmatpush1.bf16.msra.mxu1 %v1456_v55 }
  0x61   : > { %570 = vmatprep.subr.bf16.mxu0 %v1461_v56  ;;  %846 = vmatprep.subr.bf16.mxu1 %v1461_v56 }
  0x64   : > { %571 = vmatpush1.bf16.msra.mxu0 %v1459_v59  ;;  %847 = vmatpush1.bf16.msra.mxu1 %v1459_v59 }
  0x65   : > { %789 = vmatprep.subr.bf16.mxu0 %v1464_v60  ;;  %1021 = vmatprep.subr.bf16.mxu1 %v1464_v60 }
  0x67   : > { %589 = vmatmul.mubr.bf16.vlgmr.msra.gmra.mrb[0].mxu0 %v1618_v24  ;;  %865 = vmatmul.mubr.bf16.vlgmr.msra.gmra.mrb[0].mxu1 %v707_v61  ;;  %v1499_v24 = vld [vmem:[%s1840_s1 + $0x240] ss:$8 sps:$4 sm:$0xff]  }
  0x68   : > { %790 = vmatpush1.bf16.msra.mxu0 %v1462_v62  ;;  %1022 = vmatpush1.bf16.msra.mxu1 %v1462_v62 }
  0x69   : > { %791 = vmatprep.subr.bf16.mxu0 %v1467_v63  ;;  %1023 = vmatprep.subr.bf16.mxu1 %v1467_v63 }
  0x6a   : > { %821 = vmatprep.mubr.bf16.mxu0 %v1520_v2  ;;  %1053 = vmatprep.mubr.bf16.mxu1 %v1520_v2 }
  0x6c   : > { %792 = vmatpush1.bf16.msra.mxu0 %v1465_v0  ;;  %1024 = vmatpush1.bf16.msra.mxu1 %v1465_v0 }
  0x6d   : > { %793 = vmatprep.subr.bf16.mxu0 %v1470_v1  ;;  %1025 = vmatprep.subr.bf16.mxu1 %v1470_v1 }
  0x70   : > { %794 = vmatpush1.bf16.msra.mxu0 %v1468_v3  ;;  %1026 = vmatpush1.bf16.msra.mxu1 %v1468_v3 }
  0x71   : > { %795 = vmatprep.subr.bf16.mxu0 %v1473_v4  ;;  %1027 = vmatprep.subr.bf16.mxu1 %v1473_v4 }
  0x74   : > { %796 = vmatpush1.bf16.msra.mxu0 %v1471_v5  ;;  %1028 = vmatpush1.bf16.msra.mxu1 %v1471_v5 }
  0x75   : > { %797 = vmatprep.subr.bf16.mxu0 %v1476_v6  ;;  %1029 = vmatprep.subr.bf16.mxu1 %v1476_v6 }
  0x78   : > { %798 = vmatpush1.bf16.msra.mxu0 %v1474_v7  ;;  %1030 = vmatpush1.bf16.msra.mxu1 %v1474_v7 }
  0x79   : > { %799 = vmatprep.subr.bf16.mxu0 %v1479_v8  ;;  %1031 = vmatprep.subr.bf16.mxu1 %v1479_v8 }
  0x7c   : > { %800 = vmatpush1.bf16.msra.mxu0 %v1477_v9  ;;  %1032 = vmatpush1.bf16.msra.mxu1 %v1477_v9 }
  0x7d   : > { %801 = vmatprep.subr.bf16.mxu0 %v1482_v10  ;;  %1033 = vmatprep.subr.bf16.mxu1 %v1482_v10 }
  0x80   : > { %802 = vmatpush1.bf16.msra.mxu0 %v1480_v11  ;;  %1034 = vmatpush1.bf16.msra.mxu1 %v1480_v11 }
  0x81   : > { %803 = vmatprep.subr.bf16.mxu0 %v1485_v12  ;;  %1035 = vmatprep.subr.bf16.mxu1 %v1485_v12 }
  0x84   : > { %804 = vmatpush1.bf16.msra.mxu0 %v1483_v14  ;;  %1036 = vmatpush1.bf16.msra.mxu1 %v1483_v14 }
  0x85   : > { %978 = vmatprep.subr.bf16.mxu0 %v1488_v15  ;;  %1070 = vmatprep.subr.bf16.mxu1 %v1488_v15 }
  0x87   : > { %822 = vmatmul.mubr.bf16.vlgmr.msra.gmra.mrb[0].mxu0 %v707_v61  ;;  %1054 = vmatmul.mubr.bf16.vlgmr.msra.gmra.mrb[0].mxu1 %v896_v16 }
  0x88   : > { %979 = vmatpush1.bf16.msra.mxu0 %v1486_v17  ;;  %1071 = vmatpush1.bf16.msra.mxu1 %v1486_v17 }
  0x89   : > { %980 = vmatprep.subr.bf16.mxu0 %v1492_v18  ;;  %1072 = vmatprep.subr.bf16.mxu1 %v1492_v18 }
  0x8a   : > { %1010 = vmatprep.mubr.bf16.mxu0 %v1520_v2  ;;  %1102 = vmatprep.mubr.bf16.mxu1 %v1520_v2  ;;  %v1501_v2 = vld [vmem:[%s1840_s1 + $0x244] ss:$8 sps:$4 sm:$0xff]  }
  0x8c   : > { %981 = vmatpush1.bf16.msra.mxu0 %v1490_v19  ;;  %1073 = vmatpush1.bf16.msra.mxu1 %v1490_v19 }
  0x8d   : > { %982 = vmatprep.subr.bf16.mxu0 %v1495_v20  ;;  %1074 = vmatprep.subr.bf16.mxu1 %v1495_v20 }
  0x90   : > { %983 = vmatpush1.bf16.msra.mxu0 %v1493_v21  ;;  %1075 = vmatpush1.bf16.msra.mxu1 %v1493_v21 }
  0x91   : > { %984 = vmatprep.subr.bf16.mxu0 %v1498_v22  ;;  %1076 = vmatprep.subr.bf16.mxu1 %v1498_v22 }
  0x94   : > { %985 = vmatpush1.bf16.msra.mxu0 %v1496_v23  ;;  %1077 = vmatpush1.bf16.msra.mxu1 %v1496_v23 }
  0x95   : > { %986 = vmatprep.subr.bf16.mxu0 %v1501_v2  ;;  %1078 = vmatprep.subr.bf16.mxu1 %v1501_v2 }
  0x98   : > { %987 = vmatpush1.bf16.msra.mxu0 %v1499_v24  ;;  %1079 = vmatpush1.bf16.msra.mxu1 %v1499_v24 }
  0x99   : > { %988 = vmatprep.subr.bf16.mxu0 %v1504_v25  ;;  %1080 = vmatprep.subr.bf16.mxu1 %v1504_v25 }
  0x9c   : > { %989 = vmatpush1.bf16.msra.mxu0 %v1502_v26  ;;  %1081 = vmatpush1.bf16.msra.mxu1 %v1502_v26 }
  0x9d   : > { %990 = vmatprep.subr.bf16.mxu0 %v1507_v27  ;;  %1082 = vmatprep.subr.bf16.mxu1 %v1507_v27 }
  0xa0   : > { %991 = vmatpush1.bf16.msra.mxu0 %v1505_v28  ;;  %1083 = vmatpush1.bf16.msra.mxu1 %v1505_v28 }
  0xa1   : > { %992 = vmatprep.subr.bf16.mxu0 %v1510_v29  ;;  %1084 = vmatprep.subr.bf16.mxu1 %v1510_v29 }
  0xa4   : > { %993 = vmatpush1.bf16.msra.mxu0 %v1508_v31  ;;  %1085 = vmatpush1.bf16.msra.mxu1 %v1508_v31 }
  0xa7   : > { %1011 = vmatmul.mubr.bf16.vlgmr.msra.gmra.mrb[0].mxu0 %v896_v16  ;;  %1103 = vmatmul.mubr.bf16.vlgmr.msra.gmra.mrb[0].mxu1 %v1068_v32 }
 0x17a   : > { %v1012_v33 = vpop.f32.mrb[0].mxu0  ;;  %v1104_v34 = vpop.f32.mrb[0].mxu1 }
 0x17b   : > { %v1014_v35 = vpop.f32.mrb[1].mxu0  ;;  %v1106_v36 = vpop.f32.mrb[1].mxu1 }
 0x17c   : > { %v1113_v37 = vmax.f32 %v1012_v33, %v1014_v35  ;;  %v1114_v38 = vmax.f32 %v1104_v34, %v1106_v36  ;;  %v1016_v39 = vpop.f32.mrb[2].mxu0  ;;  %v1108_v40 = vpop.f32.mrb[2].mxu1 }
 0x17d   : > { %v1017_v42 = vpop.f32.mrb[3].mxu0  ;;  %v1109_v43 = vpop.f32.mrb[3].mxu1 }
 0x17e   : > { %v1115_v44 = vmax.f32 %v1113_v37, %v1114_v38 }
 0x180   : > { %v1123_v45 = vadd.f32 %v1343_v41, %v1115_v44 }
 0x182   : > { %v1124_v46 = vmax.f32 %v1123_v45, 0.0 }
 0x184   : > { %v1125_v48 = vpack.c.bf16 %v1124_v46, %v1124_v46 }
 0x186   : > { %v1130_v49 = vsel %vm1128_vm2, %v1125_v48, %v1129_v47 }
 0x187   : > { %1131 = vst [vmem:[%s168_s11] sm:$0x7] %v1130_v49 }
 0x188 PF: > { %s13_s12 = sadd.s32 1, %s1518_s12  }
 0x189   : > { %p10_p4 = scmp.ge.s32.totalorder %s13_s12, 4  }
 0x18b   :  { %12 = sbr.rel (!%p10_p4) target bundleno = 1 (0x1), region = 67 }

// kernel: net_forward.5
= control target key start
LH: loop header
LB: loop body
LE: loop exit
PB: predicated region body
PF: predicated region fallthrough
CT: control target
= control target key end

     0   :  { %v1005_v33 = vmov 0.0   ;;  %vm1006_vm0 = vmmov 0   ;;  %s1275_s1 = inlined_call_operand.vmem [shape: bf16[640,128], index: 1, kind: input, shape index: {}]   ;;  %s1276_s0 = inlined_call_operand.vmem [shape: bf16[16,640], index: 0, kind: input, shape index: {}]   ;;  %s1277_s3 = inlined_call_operand.vmem [shape: bf16[128,128], index: 3, kind: input, shape index: {}]   ;;  %s1278_s5 = inlined_call_operand.vmem [shape: bf16[128,128], index: 5, kind: input, shape index: {}]   ;;  %s1279_s2 = inlined_call_operand.vmem [shape: f32[1,128], index: 2, kind: input, shape index: {}]   ;;  %s1280_s4 = inlined_call_operand.vmem [shape: f32[1,128], index: 4, kind: input, shape index: {}]   ;;  %s1281_s6 = inlined_call_operand.vmem [shape: f32[1,128], index: 6, kind: input, shape index: {}]   ;;  %s1282_s7 = inlined_call_operand.vmem [shape: f32[16,128], index: 7, kind: output, shape index: {}]  }
   0x1   :  { %v942_v0 = vld [vmem:[%s1275_s1 + $0x40] sm:$0xff]   ;;  %v946_v4 = vld [vmem:[%s1275_s1 + $0x48] sm:$0xff]   ;;  %v950_v8 = vld [vmem:[%s1275_s1 + $0x50] sm:$0xff]  }
   0x2   :  { %v943_v1 = vld [vmem:[%s1275_s1] sm:$0xff]   ;;  %809 = vmatprep.subr.bf16.mxu0 %v942_v0  ;;  %v947_v5 = vld [vmem:[%s1275_s1 + $0x8] sm:$0xff]   ;;  %v951_v9 = vld [vmem:[%s1275_s1 + $0x10] sm:$0xff]  }
   0x3   :  { %v944_v2 = vld [vmem:[%s1275_s1 + $0xc0] sm:$0xff]   ;;  %810 = vmatpush3.bf16.msra.mxu0 %v943_v1  ;;  %v948_v6 = vld [vmem:[%s1275_s1 + $0xc8] sm:$0xff]   ;;  %v952_v10 = vld [vmem:[%s1275_s1 + $0xd0] sm:$0xff]  }
   0x4   :  { %v945_v3 = vld [vmem:[%s1275_s1 + $0x80] sm:$0xff]   ;;  %831 = vmatprep.subr.bf16.mxu1 %v944_v2  ;;  %811 = vmatprep.subr.bf16.mxu0 %v946_v4  ;;  %v949_v7 = vld [vmem:[%s1275_s1 + $0x88] sm:$0xff]   ;;  %v953_v11 = vld [vmem:[%s1275_s1 + $0x90] sm:$0xff]  }
   0x5   :  { %832 = vmatpush3.bf16.msra.mxu1 %v945_v3  ;;  %v954_v12 = vld [vmem:[%s1275_s1 + $0x58] sm:$0xff]   ;;  %v958_v16 = vld [vmem:[%s1275_s1 + $0x60] sm:$0xff]   ;;  %v962_v20 = vld [vmem:[%s1275_s1 + $0x68] sm:$0xff]  }
   0x6   :  { %833 = vmatprep.subr.bf16.mxu1 %v948_v6  ;;  %v955_v13 = vld [vmem:[%s1275_s1 + $0x18] sm:$0xff]   ;;  %v959_v17 = vld [vmem:[%s1275_s1 + $0x20] sm:$0xff]   ;;  %v963_v21 = vld [vmem:[%s1275_s1 + $0x28] sm:$0xff]  }
   0x7   :  { %812 = vmatpush3.bf16.msra.mxu0 %v947_v5  ;;  %v956_v14 = vld [vmem:[%s1275_s1 + $0xd8] sm:$0xff]   ;;  %v960_v18 = vld [vmem:[%s1275_s1 + $0xe0] sm:$0xff]   ;;  %v964_v22 = vld [vmem:[%s1275_s1 + $0xe8] sm:$0xff]  }
   0x8   :  { %813 = vmatprep.subr.bf16.mxu0 %v950_v8  ;;  %v957_v15 = vld [vmem:[%s1275_s1 + $0x98] sm:$0xff]   ;;  %v961_v19 = vld [vmem:[%s1275_s1 + $0xa0] sm:$0xff]   ;;  %v965_v23 = vld [vmem:[%s1275_s1 + $0xa8] sm:$0xff]  }
   0x9   :  { %834 = vmatpush3.bf16.msra.mxu1 %v949_v7  ;;  %v966_v24 = vld [vmem:[%s1275_s1 + $0x70] sm:$0xff]   ;;  %v970_v28 = vld [vmem:[%s1275_s1 + $0x78] sm:$0xff]   ;;  %v979_v36 = vld [vmem:[%s1276_s0 + $0xc] ss:$20 sps:$4 sm:$0xff]  }
   0xa   :  { %835 = vmatprep.subr.bf16.mxu1 %v952_v10  ;;  %v967_v25 = vld [vmem:[%s1275_s1 + $0x30] sm:$0xff]   ;;  %v971_v29 = vld [vmem:[%s1275_s1 + $0x38] sm:$0xff]   ;;  %v980_v37 = vld [vmem:[%s1275_s1 + $0x100] sm:$0xff]   ;;  %459 = vmatprep.mubr.bf16.mxu1 %v979_v36 }
   0xb   :  { %814 = vmatpush3.bf16.msra.mxu0 %v951_v9  ;;  %v968_v26 = vld [vmem:[%s1275_s1 + $0xf0] sm:$0xff]   ;;  %v972_v30 = vld [vmem:[%s1275_s1 + $0xf8] sm:$0xff]   ;;  %v981_v38 = vld [vmem:[%s1275_s1 + $0x108] sm:$0xff]  }
   0xc   :  { %815 = vmatprep.subr.bf16.mxu0 %v954_v12  ;;  %v969_v27 = vld [vmem:[%s1275_s1 + $0xb0] sm:$0xff]   ;;  %v975_v32 = vld [vmem:[%s1276_s0 + $0x4] ss:$20 sps:$4 sm:$0xff]   ;;  %v977_v35 = vld [vmem:[%s1276_s0 + $0x8] ss:$20 sps:$4 sm:$0xff]  }
   0xd   :  { %836 = vmatpush3.bf16.msra.mxu1 %v953_v11  ;;  %v973_v31 = vld [vmem:[%s1276_s0] ss:$20 sps:$4 sm:$0xff]   ;;  %v976_v34 = vld [vmem:[%s1275_s1 + $0xb8] sm:$0xff]   ;;  %418 = vmatprep.mubr.bf16.mxu0 %v975_v32  ;;  %v985_v42 = vld [vmem:[%s1275_s1 + $0x128] sm:$0xff]  }
   0xe   :  { %837 = vmatprep.subr.bf16.mxu1 %v956_v14  ;;  %v982_v39 = vld [vmem:[%s1275_s1 + $0x110] sm:$0xff]   ;;  %v983_v40 = vld [vmem:[%s1275_s1 + $0x118] sm:$0xff]   ;;  %v984_v41 = vld [vmem:[%s1275_s1 + $0x120] sm:$0xff]  }
   0xf   :  { %816 = vmatpush3.bf16.msra.mxu0 %v955_v13  ;;  %v986_v43 = vld [vmem:[%s1275_s1 + $0x130] sm:$0xff]   ;;  %v987_v44 = vld [vmem:[%s1275_s1 + $0x138] sm:$0xff]   ;;  %v989_v46 = vld [vmem:[%s1277_s3] sm:$0xff]  }
  0x10   :  { %817 = vmatprep.subr.bf16.mxu0 %v958_v16  ;;  %v988_v45 = vld [vmem:[%s1276_s0 + $0x10] ss:$20 sps:$4 sm:$0xff]   ;;  %v990_v47 = vld [vmem:[%s1277_s3 + $0x8] sm:$0xff]   ;;  %v992_v49 = vld [vmem:[%s1277_s3 + $0x18] sm:$0xff]  }
  0x11   :  { %838 = vmatpush3.bf16.msra.mxu1 %v957_v15  ;;  %v991_v48 = vld [vmem:[%s1277_s3 + $0x10] sm:$0xff]   ;;  %v993_v50 = vld [vmem:[%s1277_s3 + $0x20] sm:$0xff]   ;;  %v994_v51 = vld [vmem:[%s1277_s3 + $0x28] sm:$0xff]  }
  0x12   :  { %839 = vmatprep.subr.bf16.mxu1 %v960_v18  ;;  %v995_v52 = vld [vmem:[%s1277_s3 + $0x30] sm:$0xff]   ;;  %v996_v53 = vld [vmem:[%s1277_s3 + $0x38] sm:$0xff]   ;;  %v997_v54 = vld [vmem:[%s1278_s5] sm:$0xff]  }
  0x13   :  { %818 = vmatpush3.bf16.msra.mxu0 %v959_v17  ;;  %v998_v55 = vld [vmem:[%s1278_s5 + $0x8] sm:$0xff]   ;;  %v999_v56 = vld [vmem:[%s1278_s5 + $0x10] sm:$0xff]   ;;  %v1000_v57 = vld [vmem:[%s1278_s5 + $0x18] sm:$0xff]  }
  0x14   :  { %819 = vmatprep.subr.bf16.mxu0 %v962_v20  ;;  %v1001_v58 = vld [vmem:[%s1278_s5 + $0x20] sm:$0xff]   ;;  %v1002_v59 = vld [vmem:[%s1278_s5 + $0x28] sm:$0xff]  }
  0x15   :  { %840 = vmatpush3.bf16.msra.mxu1 %v961_v19  ;;  %v745_v61 = vld [vmem:[%s1279_s2] ss:$0 sm:$0xff] }
  0x16   :  { %841 = vmatprep.subr.bf16.mxu1 %v964_v22  ;;  %v1003_v22 = vld [vmem:[%s1278_s5 + $0x30] sm:$0xff]  }
  0x17   :  { %820 = vmatpush3.bf16.msra.mxu0 %v963_v21 }
  0x18   :  { %821 = vmatprep.subr.bf16.mxu0 %v966_v24  ;;  %v791_v24 = vld [vmem:[%s1280_s4] ss:$0 sm:$0xff] }
  0x19   :  { %842 = vmatpush3.bf16.msra.mxu1 %v965_v23  ;;  %v1004_v23 = vld [vmem:[%s1278_s5 + $0x38] sm:$0xff]  }
  0x1a   :  { %843 = vmatprep.subr.bf16.mxu1 %v968_v26 }
  0x1b   :  { %822 = vmatpush3.bf16.msra.mxu0 %v967_v25 }
  0x1c   :  { %823 = vmatprep.subr.bf16.mxu0 %v970_v28 }
  0x1d   :  { %844 = vmatpush3.bf16.msra.mxu1 %v969_v27 }
  0x1e   :  { %845 = vmatprep.subr.bf16.mxu1 %v972_v30 }
  0x1f   :  { %824 = vmatpush3.bf16.msra.mxu0 %v971_v29 }
  0x20   :  { %880 = vmatprep.subr.bf16.mxu0 %v1005_v33 }
  0x21   :  { %846 = vmatpush3.bf16.msra.mxu1 %v976_v34 }
  0x22   :  { %419 = vmatmul.mubr.bf16.vlgmr.msra.gmra.mrb[0].mxu0 %v973_v31  ;;  %900 = vmatprep.subr.bf16.mxu1 %v1005_v33 }
  0x23   :  { %896 = vmatprep.mubr.msk.bf16.mxu0 %vm1006_vm0, %v1005_v33  ;;  %881 = vmatpush3.bf16.msra.mxu0 %v980_v37 }
  0x24   :  { %460 = vmatmul.mubr.bf16.vlgmr.msra.gmra.mrb[0].mxu1 %v977_v35  ;;  %882 = vmatprep.subr.bf16.mxu0 %v1005_v33 }
  0x25   :  { %916 = vmatprep.mubr.msk.bf16.mxu1 %vm1006_vm0, %v1005_v33  ;;  %901 = vmatpush3.bf16.msra.mxu1 %v989_v46 }
  0x26   :  { %902 = vmatprep.subr.bf16.mxu1 %v1005_v33 }
  0x27   :  { %883 = vmatpush3.bf16.msra.mxu0 %v981_v38 }
  0x28   :  { %884 = vmatprep.subr.bf16.mxu0 %v1005_v33 }
  0x29   :  { %903 = vmatpush3.bf16.msra.mxu1 %v990_v47 }
  0x2a   :  { %904 = vmatprep.subr.bf16.mxu1 %v1005_v33 }
  0x2b   :  { %885 = vmatpush3.bf16.msra.mxu0 %v982_v39 }
  0x2c   :  { %886 = vmatprep.subr.bf16.mxu0 %v1005_v33 }
  0x2d   :  { %905 = vmatpush3.bf16.msra.mxu1 %v991_v48 }
  0x2e   :  { %906 = vmatprep.subr.bf16.mxu1 %v1005_v33 }
  0x2f   :  { %887 = vmatpush3.bf16.msra.mxu0 %v983_v40 }
  0x30   :  { %888 = vmatprep.subr.bf16.mxu0 %v1005_v33 }
  0x31   :  { %907 = vmatpush3.bf16.msra.mxu1 %v992_v49 }
  0x32   :  { %908 = vmatprep.subr.bf16.mxu1 %v1005_v33 }
  0x33   :  { %889 = vmatpush3.bf16.msra.mxu0 %v984_v41 }
  0x34   :  { %890 = vmatprep.subr.bf16.mxu0 %v1005_v33 }
  0x35   :  { %909 = vmatpush3.bf16.msra.mxu1 %v993_v50 }
  0x36   :  { %910 = vmatprep.subr.bf16.mxu1 %v1005_v33 }
  0x37   :  { %891 = vmatpush3.bf16.msra.mxu0 %v985_v42 }
  0x38   :  { %892 = vmatprep.subr.bf16.mxu0 %v1005_v33 }
  0x39   :  { %911 = vmatpush3.bf16.msra.mxu1 %v994_v51 }
  0x3a   :  { %912 = vmatprep.subr.bf16.mxu1 %v1005_v33 }
  0x3b   :  { %893 = vmatpush3.bf16.msra.mxu0 %v986_v43 }
  0x3c   :  { %894 = vmatprep.subr.bf16.mxu0 %v1005_v33 }
  0x3d   :  { %913 = vmatpush3.bf16.msra.mxu1 %v995_v52 }
  0x3e   :  { %914 = vmatprep.subr.bf16.mxu1 %v1005_v33 }
  0x3f   :  { %895 = vmatpush3.bf16.msra.mxu0 %v987_v44 }
  0x40   :  { %920 = vmatprep.subr.bf16.mxu0 %v1005_v33 }
  0x41   :  { %915 = vmatpush3.bf16.msra.mxu1 %v996_v53 }
  0x42   :  { %897 = vmatmul.mubr.bf16.vlgmr.msra.gmra.mrb[4].mxu0 %v988_v45 }
  0x43   :  { %936 = vmatprep.mubr.msk.bf16.mxu0 %vm1006_vm0, %v1005_v33  ;;  %921 = vmatpush3.bf16.msra.mxu0 %v997_v54 }
  0x44   :  { %922 = vmatprep.subr.bf16.mxu0 %v1005_v33 }
  0x47   :  { %923 = vmatpush3.bf16.msra.mxu0 %v998_v55 }
  0x48   :  { %924 = vmatprep.subr.bf16.mxu0 %v1005_v33 }
  0x4b   :  { %925 = vmatpush3.bf16.msra.mxu0 %v999_v56 }
  0x4c   :  { %926 = vmatprep.subr.bf16.mxu0 %v1005_v33 }
  0x4f   :  { %927 = vmatpush3.bf16.msra.mxu0 %v1000_v57 }
  0x50   :  { %928 = vmatprep.subr.bf16.mxu0 %v1005_v33 }
  0x53   :  { %929 = vmatpush3.bf16.msra.mxu0 %v1001_v58 }
  0x54   :  { %930 = vmatprep.subr.bf16.mxu0 %v1005_v33 }
  0x57   :  { %931 = vmatpush3.bf16.msra.mxu0 %v1002_v59 }
  0x58   :  { %932 = vmatprep.subr.bf16.mxu0 %v1005_v33 }
  0x5b   :  { %933 = vmatpush3.bf16.msra.mxu0 %v1003_v22 }
  0x5c   :  { %934 = vmatprep.subr.bf16.mxu0 %v1005_v33  ;;  %v800_v33 = vld [vmem:[%s1281_s6] ss:$0 sm:$0xff] }
  0x5f   :  { %935 = vmatpush3.bf16.msra.mxu0 %v1004_v23 }
  0xf5   :  { %v825_v60 = vpop.f32.mrb[0].mxu0 }
  0xf6   :  { %v826_v62 = vpop.f32.mrb[1].mxu0 }
  0xf7   :  { %v827_v63 = vadd.f32 %v826_v62, %v825_v60  ;;  %v828_v0 = vpop.f32.mrb[2].mxu0  ;;  %v847_v1 = vpop.f32.mrb[0].mxu1 }
  0xf8   :  { %v829_v2 = vpop.f32.mrb[3].mxu0  ;;  %v848_v5 = vpop.f32.mrb[1].mxu1 }
  0xf9   :  { %v421_v3 = vadd.f32 %v827_v63, %v745_v61  ;;  %v830_v4 = vadd.f32 %v829_v2, %v828_v0  ;;  %v849_v6 = vadd.f32 %v848_v5, %v847_v1  ;;  %v850_v7 = vpop.f32.mrb[2].mxu1 }
  0xfa   :  { %v851_v9 = vpop.f32.mrb[3].mxu1 }
  0xfb   :  { %v424_v8 = vadd.f32 %v830_v4, %v745_v61  ;;  %v852_v10 = vadd.f32 %v851_v9, %v850_v7  ;;  %v462_v11 = vadd.f32 %v849_v6, %v421_v3 }
  0xfd   :  { %v465_v12 = vadd.f32 %v852_v10, %v424_v8 }
 0x115   :  { %v502_v13 = vpop.f32.mrb[4].mxu0 }
 0x116   :  { %v503_v14 = vadd.f32 %v502_v13, %v462_v11  ;;  %v898_v15 = vpop.f32.mrb[5].mxu0 }
 0x117   :  { %v505_v16 = vpop.f32.mrb[6].mxu0 }
 0x118   :  { %v506_v17 = vadd.f32 %v505_v16, %v465_v12  ;;  %v899_v18 = vpop.f32.mrb[7].mxu0  ;;  %v509_v19 = vmax.f32 %v503_v14, 0.0 }
 0x11a   :  { %v510_v20 = vmax.f32 %v506_v17, 0.0 }
 0x11c   :  { %v511_v21 = vpack.c.bf16 %v510_v20, %v509_v19 }
 0x11e   :  { %917 = vmatmul.mubr.bf16.vlgmr.msra.gmra.mrb[4].mxu1 %v511_v21 }
 0x1f1   :  { %v617_v25 = vpop.f32.mrb[4].mxu1 }
 0x1f2   :  { %v618_v26 = vadd.f32 %v791_v24, %v617_v25  ;;  %v918_v27 = vpop.f32.mrb[5].mxu1 }
 0x1f3   :  { %v620_v28 = vpop.f32.mrb[6].mxu1 }
 0x1f4   :  { %v621_v29 = vadd.f32 %v791_v24, %v620_v28  ;;  %v919_v30 = vpop.f32.mrb[7].mxu1  ;;  %v624_v31 = vmax.f32 %v618_v26, 0.0 }
 0x1f6   :  { %v625_v32 = vmax.f32 %v621_v29, 0.0 }
 0x1f8   :  { %v626_v34 = vpack.c.bf16 %v625_v32, %v624_v31 }
 0x1fa   :  { %937 = vmatmul.mubr.bf16.vlgmr.msra.gmra.mrb[8].mxu0 %v626_v34 }
 0x2cd   :  { %v732_v35 = vpop.f32.mrb[8].mxu0 }
 0x2ce   :  { %v733_v36 = vadd.f32 %v800_v33, %v732_v35  ;;  %v938_v37 = vpop.f32.mrb[9].mxu0 }
 0x2cf   :  { %v735_v38 = vpop.f32.mrb[10].mxu0 }
 0x2d0   :  { %739 = vst [vmem:[%s1282_s7] sm:$0xff] %v733_v36  ;;  %v736_v39 = vadd.f32 %v800_v33, %v735_v38  ;;  %v939_v40 = vpop.f32.mrb[11].mxu0 }
 0x2d2   :  { %740 = vst [vmem:[%s1282_s7 + $0x8] sm:$0xff] %v736_v39 }

</bundles_post_ra>
